<compile_context>
chip_gen: v7x
topology: tpu7x:2x2x1
jax: 0.10.0
libtpu: 0.0.40
codegen_flags: <defaults>
</compile_context>

<pallas_src>
import jax
import jax.numpy as jnp
from jax.experimental import pallas as pl
from jax.experimental.pallas import tpu as pltpu

NEG_SLOPE = 0.01  # nn.LeakyReLU default

# Per-(1, C, t_hw) block byte budget.  6 arrays x 2 buffers => 12x this resident
# in VMEM (24 MiB), which fits the 32 MiB scoped limit on v5e/v6e/v7x.
_BLOCK_BYTES_CAP = 2 * 1024 * 1024
_VMEM_LIMIT_BYTES = 32 * 1024 * 1024


# --------------------------------------------------------------------------- #
# Pallas fuse kernel: grid = (N, HW_tiles); block = (1, C, t_hw)
# --------------------------------------------------------------------------- #
def _fuse_kernel(coef_ref,                       # SMEM (N*9,) f32, scalar-prefetched
                 rgb_ref, ir_ref, dep_ref,       # VMEM (1, C, t_hw)
                 o_rgb_ref, o_ir_ref, o_dep_ref):
    base = pl.program_id(0) * 9                  # per-sample coefficient offset

    a0 = coef_ref[base + 0]
    a1 = coef_ref[base + 1]
    a2 = coef_ref[base + 2]
    b0 = coef_ref[base + 3]
    b1 = coef_ref[base + 4]
    b2 = coef_ref[base + 5]
    c0 = coef_ref[base + 6]
    c1 = coef_ref[base + 7]
    c2 = coef_ref[base + 8]

    # Direct ref expressions (no whole-block pre-materialization of all three
    # inputs) -> low vreg pressure; f32 scalars promote bf16 inputs to f32,
    # cast back at the store.  The binding resource is HBM bandwidth.
    o_rgb_ref[...] = (ir_ref[...] * a0 + dep_ref[...] * a1 + a2).astype(o_rgb_ref.dtype)
    o_ir_ref[...] = (rgb_ref[...] * b0 + dep_ref[...] * b1 + b2).astype(o_ir_ref.dtype)
    o_dep_ref[...] = (rgb_ref[...] * c0 + ir_ref[...] * c1 + c2).astype(o_dep_ref.dtype)


# --------------------------------------------------------------------------- #
# Coefficient heads (pool + MLP) hoisted to plain JAX (tiny, M=1-per-sample)
# --------------------------------------------------------------------------- #
def _coefficients(x_rgb, x_ir, x_depth, params):
    """Returns (N, 9) f32: [mpe1(rgb) | mpe2(ir) | mpe3(depth)]."""
    # TODO(synk): the pooling pass re-reads all three inputs from HBM; in a
    # full model, emit the channel means as a by-product of the upstream layer.
    w1, b1, w2, b2 = params  # (3,128,64), (3,1,64), (3,64,3), (3,1,3)
    pooled = jnp.stack(
        [
            jnp.mean(x_rgb.astype(jnp.float32), axis=(2, 3)),
            jnp.mean(x_ir.astype(jnp.float32), axis=(2, 3)),
            jnp.mean(x_depth.astype(jnp.float32), axis=(2, 3)),
        ],
        axis=0,
    )  # (3, N, 128)
    h = jnp.einsum("mnc,mcd->mnd", pooled, w1,
                   preferred_element_type=jnp.float32) + b1          # (3, N, 64)
    h = jnp.where(h > 0, h, NEG_SLOPE * h)
    c = jnp.einsum("mnd,mdk->mnk", h, w2,
                   preferred_element_type=jnp.float32) + b2          # (3, N, 3)
    return jnp.concatenate([c[0], c[1], c[2]], axis=-1).astype(jnp.float32)  # (N, 9)


# --------------------------------------------------------------------------- #
# Tiling helpers
# --------------------------------------------------------------------------- #
def _largest_divisor_tile(padded_hw, cap_lanes):
    """Largest 128-multiple divisor of padded_hw that is <= cap_lanes."""
    if padded_hw <= cap_lanes:
        return padded_hw
    q = padded_hw // 128
    for d in range(cap_lanes // 128, 0, -1):
        if q % d == 0:
            return d * 128
    return 128


# --------------------------------------------------------------------------- #
# Wrapper
# --------------------------------------------------------------------------- #
def corr_repr_pallas(x_rgb, x_ir, x_depth, params):
    """x_*: (N, C=128, H, W) float32/bfloat16.  Returns 3 arrays, same shape."""
    N, C, H, W = x_rgb.shape
    HW = H * W
    dt = x_rgb.dtype
    itemsize = jnp.dtype(dt).itemsize

    # Fusion coefficients for the whole batch, flattened to 1-D for SMEM.
    coef = _coefficients(x_rgb, x_ir, x_depth, params).reshape(N * 9)  # (N*9,) f32

    # ---- spatial tiling ---------------------------------------------------
    cap_lanes = max(128, (_BLOCK_BYTES_CAP // (C * itemsize)) // 128 * 128)

    if HW % 128 == 0:
        # already lane-aligned: no pad, no output slice
        padded_hw = HW
        t_hw = _largest_divisor_tile(padded_hw, cap_lanes)
    elif C * HW * itemsize <= _BLOCK_BYTES_CAP:
        # small unaligned HW: "block dim equals full array dim" exemption ->
        # no pad, no output slice (avoids an extra full HBM read+write pass)
        padded_hw = HW
        t_hw = HW
    else:
        # large unaligned HW: pad only to the next multiple of 128
        padded_hw = -(-HW // 128) * 128
        t_hw = _largest_divisor_tile(padded_hw, cap_lanes)

    num_tiles = padded_hw // t_hw
    # Keep >= 2 grid steps when possible so both TensorCores (v7x) / megacore
    # parallelism get work from the ("parallel", "parallel") sharding.
    if N * num_tiles < 2 and t_hw % 256 == 0:
        t_hw //= 2
        num_tiles *= 2

    pad = padded_hw - HW

    def prep(x):
        x = x.reshape(N, C, HW)
        if pad:
            x = jnp.pad(x, ((0, 0), (0, 0), (0, pad)))
        return x

    rgb = prep(x_rgb)
    ir = prep(x_ir)
    dep = prep(x_depth)

    mod_spec = pl.BlockSpec((1, C, t_hw), lambda n, t, coef: (n, 0, t))
    out_sds = jax.ShapeDtypeStruct((N, C, padded_hw), dt)

    fn = pl.pallas_call(
        _fuse_kernel,
        out_shape=(out_sds, out_sds, out_sds),
        grid_spec=pltpu.PrefetchScalarGridSpec(
            num_scalar_prefetch=1,                 # coef -> SMEM
            grid=(N, num_tiles),
            in_specs=[mod_spec, mod_spec, mod_spec],
            out_specs=[mod_spec, mod_spec, mod_spec],
        ),
        compiler_params=pltpu.CompilerParams(
            dimension_semantics=("parallel", "parallel"),
            vmem_limit_bytes=_VMEM_LIMIT_BYTES,
        ),
        cost_estimate=pl.CostEstimate(
            flops=12 * N * C * padded_hw,
            transcendentals=0,
            bytes_accessed=6 * N * C * padded_hw * itemsize,
        ),
    )

    o_rgb, o_ir, o_dep = fn(coef, rgb, ir, dep)

    def post(o):
        if pad:
            o = o[:, :, :HW]   # padded tail holds the bias constants; drop it
        return o.reshape(N, C, H, W)

    return post(o_rgb), post(o_ir), post(o_dep)


# --------------------------------------------------------------------------- #
# Pure-JAX reference mirroring the PyTorch forward
# --------------------------------------------------------------------------- #
def corr_repr_reference(x_rgb, x_ir, x_depth, params):
    w1, b1, w2, b2 = params

    def pool(x):
        return jnp.mean(x, axis=(2, 3))  # (N, C)

    def mpe(v, m):
        h = v @ w1[m] + b1[m, 0]
        h = jnp.where(h > 0, h, NEG_SLOPE * h)
        return h @ w2[m] + b2[m, 0]  # (N, 3)

    c_rgb = mpe(pool(x_rgb), 0)[:, :, None, None, None]
    c_ir = mpe(pool(x_ir), 1)[:, :, None, None, None]
    c_dep = mpe(pool(x_depth), 2)[:, :, None, None, None]

    x_rgb_fuse = x_ir * c_rgb[:, 0] + x_depth * c_rgb[:, 1] + c_rgb[:, 2]
    x_ir_fuse = x_rgb * c_ir[:, 0] + x_depth * c_ir[:, 1] + c_ir[:, 2]
    x_depth_fuse = x_rgb * c_dep[:, 0] + x_ir * c_dep[:, 1] + c_dep[:, 2]
    return x_rgb_fuse, x_ir_fuse, x_depth_fuse


def init_params(key):
    """Deterministic synthetic init of the 3 MPE heads (mpe1, mpe2, mpe3)."""
    k1, k2, k3, k4 = jax.random.split(key, 4)
    w1 = jax.random.normal(k1, (3, 128, 64), jnp.float32) * (1.0 / jnp.sqrt(128.0))
    b1 = jax.random.normal(k2, (3, 1, 64), jnp.float32) * 0.01
    w2 = jax.random.normal(k3, (3, 64, 3), jnp.float32) * (1.0 / jnp.sqrt(64.0))
    b2 = jax.random.normal(k4, (3, 1, 3), jnp.float32) * 0.01
    return w1, b1, w2, b2


if __name__ == "__main__":
    key = jax.random.PRNGKey(0)
    kp, kr, ki, kd = jax.random.split(key, 4)

    C = 128  # nn.Linear(128, 64) fixes the channel count
    params = init_params(kp)

    # (N, H, W): an aligned case (HW % 128 == 0) and an unaligned case that
    # exercises the full-block (no pad) path.
    for (N, H, W) in [(2, 16, 16), (1, 12, 12)]:
        x_rgb = jax.random.normal(kr, (N, C, H, W), jnp.float32)
        x_ir = jax.random.normal(ki, (N, C, H, W), jnp.float32)
        x_depth = jax.random.normal(kd, (N, C, H, W), jnp.float32)

        outs = jax.block_until_ready(corr_repr_pallas(x_rgb, x_ir, x_depth, params))
        refs = corr_repr_reference(x_rgb, x_ir, x_depth, params)
        for o, r in zip(outs, refs):
            assert o.shape == r.shape and o.dtype == r.dtype
            err = float(jnp.max(jnp.abs(o - r)))
            assert jnp.allclose(o, r, atol=1e-4, rtol=1e-4), err

    print("KERNEL_OK")
</pallas_src>

<mosaic_0001>
module attributes {stable_mosaic.version = 11 : i64} {
  func.func @_fuse_kernel(%arg0: i32, %arg1: i32, %arg2: memref<18xf32, #tpu.memory_space<smem>>, %arg3: memref<1x128x256xf32, #tpu.memory_space<vmem>>, %arg4: memref<1x128x256xf32, #tpu.memory_space<vmem>>, %arg5: memref<1x128x256xf32, #tpu.memory_space<vmem>>, %arg6: memref<1x128x256xf32, #tpu.memory_space<vmem>>, %arg7: memref<1x128x256xf32, #tpu.memory_space<vmem>>, %arg8: memref<1x128x256xf32, #tpu.memory_space<vmem>>) attributes {dimension_semantics = [#tpu.dimension_semantics<parallel>, #tpu.dimension_semantics<parallel>], iteration_bounds = array<i64: 2, 1>, scalar_prefetch = 1 : i64, scratch_operands = 0 : i64, tpu.core_type = #tpu.core_type<tc>, window_params = [{transform_indices = @transform_0, window_bounds = array<i64: 1, 128, 256>}, {transform_indices = @transform_1, window_bounds = array<i64: 1, 128, 256>}, {transform_indices = @transform_2, window_bounds = array<i64: 1, 128, 256>}, {transform_indices = @transform_3, window_bounds = array<i64: 1, 128, 256>}, {transform_indices = @transform_4, window_bounds = array<i64: 1, 128, 256>}, {transform_indices = @transform_5, window_bounds = array<i64: 1, 128, 256>}]} {
    %c9_i32 = arith.constant 9 : i32
    %0 = arith.muli %arg0, %c9_i32 : i32
    %c0_i32 = arith.constant 0 : i32
    %1 = arith.addi %0, %c0_i32 : i32
    %2 = arith.index_cast %1 : i32 to index
    %3 = memref.load %arg2[%2] : memref<18xf32, #tpu.memory_space<smem>>
    %c1_i32 = arith.constant 1 : i32
    %4 = arith.addi %0, %c1_i32 : i32
    %5 = arith.index_cast %4 : i32 to index
    %6 = memref.load %arg2[%5] : memref<18xf32, #tpu.memory_space<smem>>
    %c2_i32 = arith.constant 2 : i32
    %7 = arith.addi %0, %c2_i32 : i32
    %8 = arith.index_cast %7 : i32 to index
    %9 = memref.load %arg2[%8] : memref<18xf32, #tpu.memory_space<smem>>
    %c3_i32 = arith.constant 3 : i32
    %10 = arith.addi %0, %c3_i32 : i32
    %11 = arith.index_cast %10 : i32 to index
    %12 = memref.load %arg2[%11] : memref<18xf32, #tpu.memory_space<smem>>
    %c4_i32 = arith.constant 4 : i32
    %13 = arith.addi %0, %c4_i32 : i32
    %14 = arith.index_cast %13 : i32 to index
    %15 = memref.load %arg2[%14] : memref<18xf32, #tpu.memory_space<smem>>
    %c5_i32 = arith.constant 5 : i32
    %16 = arith.addi %0, %c5_i32 : i32
    %17 = arith.index_cast %16 : i32 to index
    %18 = memref.load %arg2[%17] : memref<18xf32, #tpu.memory_space<smem>>
    %c6_i32 = arith.constant 6 : i32
    %19 = arith.addi %0, %c6_i32 : i32
    %20 = arith.index_cast %19 : i32 to index
    %21 = memref.load %arg2[%20] : memref<18xf32, #tpu.memory_space<smem>>
    %c7_i32 = arith.constant 7 : i32
    %22 = arith.addi %0, %c7_i32 : i32
    %23 = arith.index_cast %22 : i32 to index
    %24 = memref.load %arg2[%23] : memref<18xf32, #tpu.memory_space<smem>>
    %c8_i32 = arith.constant 8 : i32
    %25 = arith.addi %0, %c8_i32 : i32
    %26 = arith.index_cast %25 : i32 to index
    %27 = memref.load %arg2[%26] : memref<18xf32, #tpu.memory_space<smem>>
    %c0 = arith.constant 0 : index
    %c0_0 = arith.constant 0 : index
    %c0_1 = arith.constant 0 : index
    %28 = vector.load %arg4[%c0, %c0_0, %c0_1] : memref<1x128x256xf32, #tpu.memory_space<vmem>>, vector<1x128x256xf32>
    %29 = vector.broadcast %3 : f32 to vector<1x128x256xf32>
    %30 = arith.mulf %28, %29 : vector<1x128x256xf32>
    %c0_2 = arith.constant 0 : index
    %c0_3 = arith.constant 0 : index
    %c0_4 = arith.constant 0 : index
    %31 = vector.load %arg5[%c0_2, %c0_3, %c0_4] : memref<1x128x256xf32, #tpu.memory_space<vmem>>, vector<1x128x256xf32>
    %32 = vector.broadcast %6 : f32 to vector<1x128x256xf32>
    %33 = arith.mulf %31, %32 : vector<1x128x256xf32>
    %34 = arith.addf %30, %33 : vector<1x128x256xf32>
    %35 = vector.broadcast %9 : f32 to vector<1x128x256xf32>
    %36 = arith.addf %34, %35 : vector<1x128x256xf32>
    %c0_5 = arith.constant 0 : index
    %c0_6 = arith.constant 0 : index
    %c0_7 = arith.constant 0 : index
    %37 = vector.load %arg6[%c0_5, %c0_6, %c0_7] : memref<1x128x256xf32, #tpu.memory_space<vmem>>, vector<1x128x256xf32>
    tpu.vector_store %arg6[%c0_5, %c0_6, %c0_7], %36 {strides = array<i32>} : memref<1x128x256xf32, #tpu.memory_space<vmem>>, vector<1x128x256xf32>,
    %c0_8 = arith.constant 0 : index
    %c0_9 = arith.constant 0 : index
    %c0_10 = arith.constant 0 : index
    %38 = vector.load %arg3[%c0_8, %c0_9, %c0_10] : memref<1x128x256xf32, #tpu.memory_space<vmem>>, vector<1x128x256xf32>
    %39 = vector.broadcast %12 : f32 to vector<1x128x256xf32>
    %40 = arith.mulf %38, %39 : vector<1x128x256xf32>
    %c0_11 = arith.constant 0 : index
    %c0_12 = arith.constant 0 : index
    %c0_13 = arith.constant 0 : index
    %41 = vector.load %arg5[%c0_11, %c0_12, %c0_13] : memref<1x128x256xf32, #tpu.memory_space<vmem>>, vector<1x128x256xf32>
    %42 = vector.broadcast %15 : f32 to vector<1x128x256xf32>
    %43 = arith.mulf %41, %42 : vector<1x128x256xf32>
    %44 = arith.addf %40, %43 : vector<1x128x256xf32>
    %45 = vector.broadcast %18 : f32 to vector<1x128x256xf32>
    %46 = arith.addf %44, %45 : vector<1x128x256xf32>
    %c0_14 = arith.constant 0 : index
    %c0_15 = arith.constant 0 : index
    %c0_16 = arith.constant 0 : index
    %47 = vector.load %arg7[%c0_14, %c0_15, %c0_16] : memref<1x128x256xf32, #tpu.memory_space<vmem>>, vector<1x128x256xf32>
    tpu.vector_store %arg7[%c0_14, %c0_15, %c0_16], %46 {strides = array<i32>} : memref<1x128x256xf32, #tpu.memory_space<vmem>>, vector<1x128x256xf32>,
    %c0_17 = arith.constant 0 : index
    %c0_18 = arith.constant 0 : index
    %c0_19 = arith.constant 0 : index
    %48 = vector.load %arg3[%c0_17, %c0_18, %c0_19] : memref<1x128x256xf32, #tpu.memory_space<vmem>>, vector<1x128x256xf32>
    %49 = vector.broadcast %21 : f32 to vector<1x128x256xf32>
    %50 = arith.mulf %48, %49 : vector<1x128x256xf32>
    %c0_20 = arith.constant 0 : index
    %c0_21 = arith.constant 0 : index
    %c0_22 = arith.constant 0 : index
    %51 = vector.load %arg4[%c0_20, %c0_21, %c0_22] : memref<1x128x256xf32, #tpu.memory_space<vmem>>, vector<1x128x256xf32>
    %52 = vector.broadcast %24 : f32 to vector<1x128x256xf32>
    %53 = arith.mulf %51, %52 : vector<1x128x256xf32>
    %54 = arith.addf %50, %53 : vector<1x128x256xf32>
    %55 = vector.broadcast %27 : f32 to vector<1x128x256xf32>
    %56 = arith.addf %54, %55 : vector<1x128x256xf32>
    %c0_23 = arith.constant 0 : index
    %c0_24 = arith.constant 0 : index
    %c0_25 = arith.constant 0 : index
    %57 = vector.load %arg8[%c0_23, %c0_24, %c0_25] : memref<1x128x256xf32, #tpu.memory_space<vmem>>, vector<1x128x256xf32>
    tpu.vector_store %arg8[%c0_23, %c0_24, %c0_25], %56 {strides = array<i32>} : memref<1x128x256xf32, #tpu.memory_space<vmem>>, vector<1x128x256xf32>,
    return
  }
  func.func @transform_0(%arg0: i32, %arg1: i32, %arg2: memref<18xf32, #tpu.memory_space<smem>>) -> (i32, i32, i32) {
    %c0_i32 = arith.constant 0 : i32
    %c0_i32_0 = arith.constant 0 : i32
    return %arg0, %c0_i32, %arg1 : i32, i32, i32
  }
  func.func @transform_1(%arg0: i32, %arg1: i32, %arg2: memref<18xf32, #tpu.memory_space<smem>>) -> (i32, i32, i32) {
    %c0_i32 = arith.constant 0 : i32
    %c0_i32_0 = arith.constant 0 : i32
    return %arg0, %c0_i32, %arg1 : i32, i32, i32
  }
  func.func @transform_2(%arg0: i32, %arg1: i32, %arg2: memref<18xf32, #tpu.memory_space<smem>>) -> (i32, i32, i32) {
    %c0_i32 = arith.constant 0 : i32
    %c0_i32_0 = arith.constant 0 : i32
    return %arg0, %c0_i32, %arg1 : i32, i32, i32
  }
  func.func @transform_3(%arg0: i32, %arg1: i32, %arg2: memref<18xf32, #tpu.memory_space<smem>>) -> (i32, i32, i32) {
    %c0_i32 = arith.constant 0 : i32
    %c0_i32_0 = arith.constant 0 : i32
    return %arg0, %c0_i32, %arg1 : i32, i32, i32
  }
  func.func @transform_4(%arg0: i32, %arg1: i32, %arg2: memref<18xf32, #tpu.memory_space<smem>>) -> (i32, i32, i32) {
    %c0_i32 = arith.constant 0 : i32
    %c0_i32_0 = arith.constant 0 : i32
    return %arg0, %c0_i32, %arg1 : i32, i32, i32
  }
  func.func @transform_5(%arg0: i32, %arg1: i32, %arg2: memref<18xf32, #tpu.memory_space<smem>>) -> (i32, i32, i32) {
    %c0_i32 = arith.constant 0 : i32
    %c0_i32_0 = arith.constant 0 : i32
    return %arg0, %c0_i32, %arg1 : i32, i32, i32
  }
}

</mosaic_0001>

<bundles_post_ra>
// kernel: tpu_custom_call.1
= control target key start
LH: loop header
LB: loop body
LE: loop exit
PB: predicated region body
PF: predicated region fallthrough
CT: control target
= control target key end

     0   :  { %s3070_s0 = inlined_call_operand.hbm [shape: f32[18], index: 0, kind: input, shape index: {}]   ;;  %s3071_s1 = inlined_call_operand.hbm [shape: f32[2,128,256], index: 1, kind: input, shape index: {}]   ;;  %s3072_s2 = inlined_call_operand.hbm [shape: f32[2,128,256], index: 2, kind: input, shape index: {}]   ;;  %s3073_s3 = inlined_call_operand.hbm [shape: f32[2,128,256], index: 3, kind: input, shape index: {}]   ;;  %s3074_s4 = inlined_call_operand.hbm [shape: f32[2,128,256], index: 4, kind: output, shape index: {0}]   ;;  %s3075_s5 = inlined_call_operand.hbm [shape: f32[2,128,256], index: 5, kind: output, shape index: {1}]   ;;  %s3076_s6 = inlined_call_operand.hbm [shape: f32[2,128,256], index: 6, kind: output, shape index: {2}]  }
   0x1   :  { %3114 = sst [smem:[#allocation48_spill]] %s3072_s2  ;;  %s1467_s23 = scalar_lea.hbm %s3070_s0, 16 }
   0x2   :  { %p1468_p0 = scmp.ne.s32.totalorder %s3070_s0, %s1467_s23  ;;  %p1471_p1 = scmp.lt.u32.totalorder %s1467_s23, %s3070_s0 }
   0x4   :  { %p1473_p2 = pnand %p1471_p1, %p1468_p0 }
   0x6   :  { %1476 = shalt.err (!%p1473_p2)  }
   0x7   :  { %s1717_s28 = smov [#allocation3]  }
   0x8   :  { %13 = dma.hbm_to_smem %s3070_s0, 16, %s1717_s28, [#allocation2] }
   0x9   :  { %1675 = dma.done.wait [#allocation2], 16 }
   0xa   :  { %1676 = vsyncadd [#allocation2], 4294967280 }
   0xb   :  { %15 = sfence }
   0xc   :  { %16 = vsyncpa [#allocation5], 0 }
   0xd   :  { %18 = vsyncpa [#allocation5 + $0x1], 0 }
   0xe   :  { %19 = vsyncpa [#allocation8], 0 }
   0xf   :  { %21 = vsyncpa [#allocation8 + $0x1], 0 }
  0x10   :  { %22 = vsyncpa [#allocation6], 0 }
  0x11   :  { %24 = vsyncpa [#allocation6 + $0x1], 0 }
  0x12   :  { %25 = vsyncpa [#allocation12], 0 }
  0x13   :  { %27 = vsyncpa [#allocation12 + $0x1], 0  ;;  %s1775_s7 = smov 0   ;;  %s1777_s8 = smov 0  }
  0x14   :  { %s1779_s9 = smov 0   ;;  %s1781_s10 = smov 0  }
  0x15   :  { %s1783_s0 = smov 0   ;;  %s1785_s11 = smov 0  }
  0x16 LB: > { %3115 = sst [smem:[#allocation19_spill]] %s1711_s0  ;;  %s1806_s12 = sadd.s32 4294967295, %s1715_s11   ;;  %s1715_s11 = sphi %s1785_s11, %s33_s11   ;;  %s1711_s0 = sphi %s1783_s0, %s3191_s0   ;;  %s1707_s10 = sphi %s1781_s10, %s3190_s10   ;;  %s1703_s9 = sphi %s1779_s9, %s3194_s9   ;;  %s1699_s8 = sphi %s1777_s8, %s3193_s8   ;;  %s1695_s7 = sphi %s1775_s7, %s3192_s7  }
  0x17   : > { %3116 = sst [smem:[#allocation20_spill]] %s1715_s11  ;;  %s3077_s13 = sadd.s32 4294967294, %s1715_s11  }
  0x18   : > { %s45_s14 = sadd.s32 1, %s1711_s0  ;;  %s54_s15 = sadd.s32 1, %s1703_s9 }
  0x19   : > { %p47_p3 = scmp.ge.s32.totalorder %s45_s14, 2  ;;  %p61_p4 = scmp.ne.s32.totalorder %s1703_s9, %s1699_s8 }
  0x1a   : > { %p62_p5 = scmp.eq.s32.totalorder %s1715_s11, 0  ;;  %p67_p6 = scmp.ne.s32.totalorder %s1699_s8, %s1695_s7 }
  0x1b   : > { %s3196_s14 = smov (%p47_p3, %s45_s14), 0  ;;  %p68_p8 = scmp.eq.s32.totalorder %s1806_s12, 0 }
  0x1c   : > { %3117 = sst [smem:[#allocation21_spill]] %s3196_s14  ;;  %p1818_p7 = por %p62_p5, %p61_p4 }
  0x1d   : > { %s49_s17 = ssub.s32 %s1711_s0, %s3196_s14  ;;  %p149_p9 = scmp.eq.s32.totalorder %s1806_s12, 1 }
  0x1e   : > { %p52_p10 = scmp.eq.s32.totalorder %s49_s17, 0  ;;  %p1826_p11 = por %p68_p8, %p67_p6 }
  0x1f   : > { %p1830_p12 = por %p149_p9, %p61_p4  ;;  %p155_p13 = scmp.eq.s32.totalorder %s3077_s13, 1 }
  0x20   : > { %s3119_s18 = scalar_select %p1826_p11, 1, 0 }
  0x21   : > { %s3120_s19 = scalar_select %p1830_p12, 1, 0 }
  0x22   : > { %s1837_s20 = scalar_select %p52_p10, %s1703_s9, %s54_s15  }
  0x23   : > { %p1839_p0 = por %p155_p13, %p67_p6  ;;  %p1412_p2 = scmp.lt.s32.totalorder %s1715_s11, 2 }
  0x24   : > { %3121 = sst [smem:[#allocation22_spill]] %s1837_s20  ;;  %s3078_s22 = sand.u32 1, %s1703_s9  }
  0x25   : > { %s3122_s21 = scalar_select %p1839_p0, 1, 0 }
  0x26   : > { %s1848_s23 = sshll.u32 %s3078_s22, 8  ;;  %s1851_s24 = sshll.u32 %s1711_s0, 12 }
  0x27   : > { %3123 = sst [smem:[#allocation23_spill]] %s3122_s21  ;;  %p1855_p3 = pnand %p1412_p2, %p1818_p7 }
  0x28   : > { %s254_s26 = sand.u32 1, %s1715_s11   ;;  %s3125_s2 = sld [smem:[#allocation48_spill]] }
  0x29   : > { %s258_s30 = scalar_lea.vmem [#allocation7], %s1848_s23  ;;  %s1871_s16 = scalar_lea.sflag [#allocation8], %s254_s26 }
  0x2a   : > { %s267_s15 = sshll.u32 %s258_s30, 4  ;;  %p1877_p7 = pneg %p1855_p3  ;;  %s1868_s15 = int_to_ptr.vmem [resolvable:$true] %s267_s15 }
  0x2e   : > { %s1864_s29 = scalar_lea.hbm %s3125_s2, %s1851_s24  ;;  %s1482_s30 = scalar_lea.hbm %s3125_s2, 8192 }
  0x2f   : > { %s1477_s17 = scalar_lea.hbm %s1864_s29, 4096  ;;  %p1483_p10 = scmp.lt.u32.totalorder %s1864_s29, %s3125_s2 }
  0x30   : > { %p1478_p6 = scmp.ne.s32.totalorder %s1864_s29, %s1477_s17  ;;  %p1484_p13 = scmp.lt.u32.totalorder %s1482_s30, %s1477_s17 }
  0x31   : > { %p1486_p1 = scmp.lt.u32.totalorder %s1477_s17, %s1864_s29 }
  0x32   : > { %p1480_p8 = pnand %p1877_p7, %p1478_p6  ;;  %p1485_p2 = por %p1484_p13, %p1483_p10 }
  0x34   : > { %p1481_p9 = pneg %p1480_p8  ;;  %p1487_p4 = por %p1486_p1, %p1485_p2 }
  0x36   : > { %p1488_p5 = pnand %p1487_p4, %p1481_p9 }
  0x38   : > { %1491 = shalt.err (!%p1488_p5)
}
  0x39   : > { %s1492_s26 = scalar_lea.vmem %s1868_s15, 4096  ;;  %s1718_s27 = smov [#allocation7]  }
  0x3a   : > { %p1493_p6 = scmp.ne.s32.totalorder %s1868_s15, %s1492_s26  ;;  %s1497_s28 = sshll.u32 %s1718_s27, 4  ;;  %s1498_s28 = int_to_ptr.vmem [resolvable:$false] %s1497_s28 }
  0x3b   : > { %s1499_s14 = scalar_lea.vmem %s1498_s28, 8192  ;;  %p1500_p12 = scmp.lt.s32.totalorder %s1868_s15, %s1498_s28 }
  0x3c   : > { %p1495_p8 = pnand %p1493_p6, %p1877_p7  ;;  %p1501_p11 = scmp.lt.s32.totalorder %s1499_s14, %s1492_s26 }
  0x3e   : > { %p1496_p0 = pneg %p1495_p8  ;;  %p1502_p10 = por %p1501_p11, %p1500_p12 }
  0x40   : > { %p1503_p13 = pnand %p1502_p10, %p1496_p0 }
  0x42   : > { %1506 = shalt.err (!%p1503_p13)
}
  0x43   : > { %s3082_s22 = smov 256   ;;  %s3084_s17 = smov 16  }
  0x44   : > { %1398 = dma.hbm_to_vmem [thread:$0]  (!%p1855_p3), %s1864_s29, 4096, %s1868_s15, %s1871_s16, %s3082_s22, %s3082_s22, %s3084_s17  }
  0x45   : > { %p3127_p11 = scmp.lt.s32.totalorder %s1715_s11, 3  ;;  %p3128_p12 = scmp.ge.s32.totalorder %s1715_s11, 1 }
  0x46   : > { %s1916_s28 = scalar_lea.hbm %s3071_s1, %s1851_s24  ;;  %s235_s14 = scalar_lea.vmem [#allocation4], %s1848_s23 }
  0x47   : > { %p1908_p0 = pnand %p3128_p12, %p3127_p11  ;;  %s244_s2 = sshll.u32 %s235_s14, 4  ;;  %s1919_s2 = int_to_ptr.vmem [resolvable:$true] %s244_s2 }
  0x48   : > { %s1925_s22 = scalar_lea.hbm %s3073_s3, %s1851_s24  ;;  %s3130_s17 = sand.u32 1, %s1703_s9  }
  0x49   : > { %s3129_s30 = scalar_select %p1908_p0, 1, 0 }
  0x4a   : > { %s1929_s0 = scalar_lea.sflag [#allocation5], %s3130_s17  ;;  %s1507_s20 = scalar_lea.hbm %s1916_s28, 4096 }
  0x4b   : > { %p1508_p1 = scmp.ne.s32.totalorder %s1916_s28, %s1507_s20  ;;  %s1512_s11 = scalar_lea.hbm %s3071_s1, 8192 }
  0x4c   : > { %p1513_p9 = scmp.lt.u32.totalorder %s1916_s28, %s3071_s1  ;;  %p1514_p2 = scmp.lt.u32.totalorder %s1512_s11, %s1507_s20 }
  0x4d   : > { %p1510_p4 = pnand %p1508_p1, %p1877_p7  ;;  %p1516_p8 = scmp.lt.u32.totalorder %s1507_s20, %s1916_s28 }
  0x4e   : > { %p1515_p6 = por %p1514_p2, %p1513_p9 }
  0x4f   : > { %p1511_p5 = pneg %p1510_p4 }
  0x50   : > { %p1517_p10 = por %p1516_p8, %p1515_p6 }
  0x52   : > { %p1518_p13 = pnand %p1517_p10, %p1511_p5 }
  0x54   : > { %1521 = shalt.err (!%p1518_p13)
}
  0x55   : > { %s1522_s24 = scalar_lea.vmem %s1919_s2, 4096  ;;  %s1721_s17 = smov [#allocation4]  }
  0x56   : > { %p1523_p11 = scmp.ne.s32.totalorder %s1919_s2, %s1522_s24  ;;  %s1527_s29 = sshll.u32 %s1721_s17, 4  ;;  %s1528_s29 = int_to_ptr.vmem [resolvable:$false] %s1527_s29 }
  0x57   : > { %s1529_s21 = scalar_lea.vmem %s1528_s29, 8192  ;;  %p1530_p4 = scmp.lt.s32.totalorder %s1919_s2, %s1528_s29 }
  0x58   : > { %p1525_p12 = pnand %p1523_p11, %p1877_p7  ;;  %p1531_p0 = scmp.lt.s32.totalorder %s1529_s21, %s1522_s24 }
  0x5a   : > { %p1526_p1 = pneg %p1525_p12  ;;  %p1532_p9 = por %p1531_p0, %p1530_p4 }
  0x5c   : > { %p1533_p2 = pnand %p1532_p9, %p1526_p1 }
  0x5e   : > { %1536 = shalt.err (!%p1533_p2)
}
  0x5f   : > { %s3131_s11 = smov 16   ;;  %s3132_s20 = smov 256  }
  0x60   : > { %1395 = dma.hbm_to_vmem [thread:$0]  (!%p1855_p3), %s1916_s28, 4096, %s1919_s2, %s1929_s0, %s3132_s20, %s3132_s20, %s3131_s11  }
  0x61   : > { %s281_s15 = scalar_lea.vmem [#allocation9], %s1848_s23  ;;  %s1537_s27 = scalar_lea.hbm %s1925_s22, 4096 }
  0x62   : > { %s290_s26 = sshll.u32 %s281_s15, 4  ;;  %p1538_p0 = scmp.ne.s32.totalorder %s1925_s22, %s1537_s27  ;;  %s1957_s26 = int_to_ptr.vmem [resolvable:$true] %s290_s26 }
  0x63   : > { %s1542_s17 = scalar_lea.hbm %s3073_s3, 8192  ;;  %p1543_p8 = scmp.lt.u32.totalorder %s1925_s22, %s3073_s3 }
  0x64   : > { %p1540_p5 = pnand %p1538_p0, %p1877_p7  ;;  %p1544_p10 = scmp.lt.u32.totalorder %s1542_s17, %s1537_s27 }
  0x65   : > { %p1546_p11 = scmp.lt.u32.totalorder %s1537_s27, %s1925_s22 }
  0x66   : > { %p1541_p6 = pneg %p1540_p5  ;;  %p1545_p13 = por %p1544_p10, %p1543_p8 }
  0x68   : > { %p1547_p12 = por %p1546_p11, %p1545_p13 }
  0x6a   : > { %p1548_p1 = pnand %p1547_p12, %p1541_p6 }
  0x6c   : > { %1551 = shalt.err (!%p1548_p1)
}
  0x6d   : > { %s1552_s2 = scalar_lea.vmem %s1957_s26, 4096  ;;  %s1722_s0 = smov [#allocation9]  }
  0x6e   : > { %p1553_p4 = scmp.ne.s32.totalorder %s1957_s26, %s1552_s2  ;;  %s1557_s23 = sshll.u32 %s1722_s0, 4  ;;  %s1558_s23 = int_to_ptr.vmem [resolvable:$false] %s1557_s23 }
  0x6f   : > { %s1559_s28 = scalar_lea.vmem %s1558_s23, 8192  ;;  %p1560_p0 = scmp.lt.s32.totalorder %s1957_s26, %s1558_s23 }
  0x70   : > { %p1555_p9 = pnand %p1553_p4, %p1877_p7  ;;  %p1561_p5 = scmp.lt.s32.totalorder %s1559_s28, %s1552_s2 }
  0x72   : > { %p1556_p2 = pneg %p1555_p9  ;;  %p1562_p8 = por %p1561_p5, %p1560_p0 }
  0x74   : > { %p1563_p10 = pnand %p1562_p8, %p1556_p2 }
  0x76   : > { %1566 = shalt.err (!%p1563_p10)
}
  0x77   : > { %1401 = dma.hbm_to_vmem [thread:$0]  (!%p1855_p3), %s1925_s22, 4096, %s1957_s26, %s1871_s16, %s3132_s20, %s3132_s20, %s3131_s11  }
  0x78   : > { %p3133_p7 = scmp.ne.s32.totalorder %s3129_s30, 0 }
  0x7a   : > { %302 = sbr.rel (%p3133_p7) target bundleno = 292 (0x124), region = 32 }
  0x81   : > { %s1987_s13 = sand.u32 1, %s1699_s8   ;;  %p3134_p6 = scmp.ne.s32.totalorder %s3119_s18, 0 }
  0x82   : > { %s1990_s15 = sshll.u32 %s1987_s13, 8  ;;  %s305_s25 = scalar_lea.sflag [#allocation5], %s1987_s13 }
  0x83   : > { %s1994_s27 = scalar_lea.vmem [#allocation4], %s1990_s15 }
  0x84   : > { %1678 = dma.done.wait (%p3134_p6), %s305_s25, 4096  }
  0x85   : > { %1680 = vsyncadd (%p3134_p6), %s305_s25, 4294963200  ;;  %s313_s16 = sand.u32 1, %s1806_s12   ;;  %s2004_s30 = scalar_lea.vmem [#allocation7], %s1990_s15 }
  0x86   : > { %s314_s22 = scalar_lea.sflag [#allocation8], %s313_s16 }
  0x87   : > { %1682 = dma.done.wait (%p3134_p6), %s314_s22, 8192  }
  0x88   : > { %1684 = vsyncadd (%p3134_p6), %s314_s22, 4294959104  ;;  %s2011_s11 = smul.u32 9, %s1707_s10  ;;  %v2017_v0 = vld [vmem:[%s1994_s27] sm:$0xff]  ;;  %s2020_s18 = scalar_lea.vmem [#allocation9], %s1990_s15  ;;  %v2026_v2 = vld [vmem:[%s1994_s27 + $0x8] sm:$0xff] }
  0x89   : > { %v2023_v1 = vld [vmem:[%s2020_s18] sm:$0xff]  ;;  %v2029_v3 = vld [vmem:[%s2020_s18 + $0x8] sm:$0xff]  ;;  %v2032_v4 = vld [vmem:[%s1994_s27 + $0x10] sm:$0xff]  ;;  %s2120_s21 = scalar_lea.vmem [#allocation11], %s1990_s15  ;;  %p3159_p13 = scmp.ne.s32.totalorder %s3120_s19, 0 }
  0x8a   : > { %s385_s20 = sadd.s32 3, %s2011_s11  ;;  %s387_s26 = sadd.s32 4, %s2011_s11  ;;  %v2035_v5 = vld [vmem:[%s2020_s18 + $0x10] sm:$0xff]  ;;  %v2038_v6 = vld [vmem:[%s1994_s27 + $0x18] sm:$0xff]  ;;  %v2048_v10 = vld [vmem:[%s1994_s27 + $0x20] sm:$0xff] }
  0x8b   : > { %s386_s14 = sld [smem:[#allocation3 + %s385_s20]]  ;;  %s389_s17 = sadd.s32 5, %s2011_s11  ;;  %v2045_v9 = vld [vmem:[%s2020_s18 + $0x18] sm:$0xff]  ;;  %v2059_v15 = vld [vmem:[%s2020_s18 + $0x20] sm:$0xff]  ;;  %v2062_v16 = vld [vmem:[%s1994_s27 + $0x28] sm:$0xff] }
  0x8c   : > { %s388_s24 = sld [smem:[#allocation3 + %s387_s26]]  ;;  %v2065_v17 = vld [vmem:[%s2020_s18 + $0x28] sm:$0xff]  ;;  %v2076_v22 = vld [vmem:[%s1994_s27 + $0x30] sm:$0xff]  ;;  %v2092_v32 = vld [vmem:[%s1994_s27 + $0x38] sm:$0xff]  ;;  %s381_s2 = sadd.s32 1, %s2011_s11 }
  0x8d   : > { %s390_s29 = sld [smem:[#allocation3 + %s389_s17]]  ;;  %v2083_v27 = vld [vmem:[%s2020_s18 + $0x30] sm:$0xff]  ;;  %v2095_v33 = vld [vmem:[%s2020_s18 + $0x38] sm:$0xff]  ;;  %v2098_v34 = vld [vmem:[%s1994_s27 + $0x40] sm:$0xff]  ;;  %s383_s0 = sadd.s32 2, %s2011_s11 }
  0x8e   : > { %3135 = vst [vmem:[#allocation24_spill] sm:$0xff] %v2098_v34  ;;  %v2105_v39 = vld [vmem:[%s2020_s18 + $0x40] sm:$0xff]  ;;  %v2111_v44 = vld [vmem:[%s1994_s27 + $0x48] sm:$0xff]  ;;  %v2117_v46 = vld [vmem:[%s1994_s27 + $0x50] sm:$0xff]  ;;  %s2332_s23 = sld [smem:[#allocation3 + %s2011_s11]]  ;;  %s1122_s22 = sshll.u32 %s2120_s21, 4  ;;  %s2473_s22 = int_to_ptr.vmem [resolvable:$true] %s1122_s22 }
  0x8f   : > { %3136 = vst [vmem:[#allocation25_spill] sm:$0xff] %v2111_v44  ;;  %v2114_v45 = vld [vmem:[%s2020_s18 + $0x48] sm:$0xff]  ;;  %3137 = vst [vmem:[#allocation26_spill] sm:$0xff] %v2117_v46  ;;  %v2132_v51 = vld [vmem:[%s2020_s18 + $0x50] sm:$0xff]  ;;  %s2346_s28 = sld [smem:[#allocation3 + %s381_s2]]  ;;  %s1723_s17 = smov [#allocation11]  }
  0x90   : > { %v2135_v52 = vld [vmem:[%s1994_s27 + $0x58] sm:$0xff]  ;;  %v2146_v58 = vld [vmem:[%s1994_s27 + $0x60] sm:$0xff]  ;;  %s2360_s25 = sld [smem:[#allocation3 + %s383_s0]] }
  0x91   : > { %v2040_v7 = vstv %s386_s14  ;;  %3138 = vst [vmem:[#allocation27_spill] sm:$0xff] %v2135_v52  ;;  %v2143_v57 = vld [vmem:[%s2020_s18 + $0x58] sm:$0xff]  ;;  %3139 = vst [vmem:[#allocation28_spill] sm:$0xff] %v2146_v58  ;;  %v2156_v63 = vld [vmem:[%s2020_s18 + $0x60] sm:$0xff]  ;;  %s2502_s14 = scalar_lea.sflag [#allocation12], %s313_s16 }
  0x92   : > { %v2042_v8 = vstv %s388_s24  ;;  %v657_v11 = vmul.f32 %v2040_v7, %v2017_v0  ;;  %v658_v13 = vmul.f32 %v2040_v7, %v2026_v2  ;;  %v659_v19 = vmul.f32 %v2040_v7, %v2032_v4  ;;  %s1567_s24 = scalar_lea.vmem %s2473_s22, 4096 }
  0x93   : > { %v722_v12 = vmul.f32 %v2042_v8, %v2023_v1  ;;  %v723_v14 = vmul.f32 %v2042_v8, %v2029_v3  ;;  %v2067_v18 = vstv %s390_s29  ;;  %v724_v20 = vmul.f32 %v2042_v8, %v2035_v5  ;;  %p1568_p3 = scmp.ne.s32.totalorder %s2473_s22, %s1567_s24  ;;  %s1571_s29 = sshll.u32 %s1723_s17, 4  ;;  %s1572_s29 = int_to_ptr.vmem [resolvable:$false] %s1571_s29 }
  0x94   : > { %v660_v21 = vmul.f32 %v2040_v7, %v2038_v6  ;;  %v725_v25 = vmul.f32 %v2042_v8, %v2045_v9  ;;  %v661_v26 = vmul.f32 %v2040_v7, %v2048_v10  ;;  %v726_v29 = vmul.f32 %v2042_v8, %v2059_v15  ;;  %p1574_p1 = scmp.lt.s32.totalorder %s2473_s22, %s1572_s29 }
  0x95   : > { %v754_v23 = vadd.f32 %v722_v12, %v657_v11  ;;  %v755_v24 = vadd.f32 %v723_v14, %v658_v13  ;;  %v756_v28 = vadd.f32 %v724_v20, %v659_v19  ;;  %v662_v30 = vmul.f32 %v2040_v7, %v2062_v16  ;;  %v2159_v11 = vld [vmem:[%s1994_s27 + $0x68] sm:$0xff]  ;;  %p1569_p11 = pnand %p1568_p3, %p3159_p13 }
  0x96   : > { %v727_v31 = vmul.f32 %v2042_v8, %v2065_v17  ;;  %v757_v37 = vadd.f32 %v725_v25, %v660_v21  ;;  %v663_v38 = vmul.f32 %v2040_v7, %v2076_v22  ;;  %v758_v41 = vadd.f32 %v726_v29, %v661_v26  ;;  %3140 = vst [vmem:[#allocation29_spill] sm:$0xff] %v2159_v11  ;;  %v2169_v20 = vld [vmem:[%s2020_s18 + $0x68] sm:$0xff]  ;;  %v2172_v21 = vld [vmem:[%s1994_s27 + $0x70] sm:$0xff]  ;;  %v2183_v29 = vld [vmem:[%s1994_s27 + $0x78] sm:$0xff] }
  0x97   : > { %v787_v35 = vadd.f32 %v2067_v18, %v754_v23  ;;  %v788_v36 = vadd.f32 %v2067_v18, %v755_v24  ;;  %v789_v40 = vadd.f32 %v2067_v18, %v756_v28  ;;  %v728_v43 = vmul.f32 %v2042_v8, %v2083_v27  ;;  %3141 = vst [vmem:[#allocation30_spill] sm:$0xff] %v2172_v21  ;;  %v2180_v28 = vld [vmem:[%s2020_s18 + $0x70] sm:$0xff]  ;;  %p1570_p12 = pneg %p1569_p11 }
  0x98   : > { %v759_v42 = vadd.f32 %v727_v31, %v662_v30  ;;  %v790_v47 = vadd.f32 %v2067_v18, %v757_v37  ;;  %v664_v48 = vmul.f32 %v2040_v7, %v2092_v32  ;;  %v729_v49 = vmul.f32 %v2042_v8, %v2095_v33  ;;  %3142 = vst [vmem:[#allocation31_spill] sm:$0xff] %v2183_v29  ;;  %v2192_v37 = vld [vmem:[%s2020_s18 + $0x78] sm:$0xff] }
  0x99   : > { %819 = vst [vmem:[%s2120_s21] sm:$0xff] %v787_v35  ;;  %820 = vst [vmem:[%s2120_s21 + $0x8] sm:$0xff] %v788_v36  ;;  %v665_v50 = vmul.f32 %v2040_v7, %v2098_v34  ;;  %v791_v53 = vadd.f32 %v2067_v18, %v758_v41  ;;  %v760_v55 = vadd.f32 %v728_v43, %v663_v38  ;;  %v2195_v38 = vld [vmem:[%s1994_s27 + $0x80] sm:$0xff] }
  0x9a   : > { %821 = vst [vmem:[%s2120_s21 + $0x10] sm:$0xff] %v789_v40  ;;  %v792_v54 = vadd.f32 %v2067_v18, %v759_v42  ;;  %v730_v56 = vmul.f32 %v2042_v8, %v2105_v39  ;;  %822 = vst [vmem:[%s2120_s21 + $0x18] sm:$0xff] %v790_v47  ;;  %v761_v59 = vadd.f32 %v729_v49, %v664_v48  ;;  %v2204_v47 = vld [vmem:[%s2020_s18 + $0x80] sm:$0xff]  ;;  %v2207_v48 = vld [vmem:[%s1994_s27 + $0x88] sm:$0xff] }
  0x9b   : > { %v666_v60 = vmul.f32 %v2040_v7, %v2111_v44  ;;  %v731_v61 = vmul.f32 %v2042_v8, %v2114_v45  ;;  %v667_v62 = vmul.f32 %v2040_v7, %v2117_v46  ;;  %823 = vst [vmem:[%s2120_s21 + $0x20] sm:$0xff] %v791_v53  ;;  %v793_v12 = vadd.f32 %v2067_v18, %v760_v55  ;;  %v2216_v55 = vld [vmem:[%s2020_s18 + $0x88] sm:$0xff] }
  0x9c   : > { %824 = vst [vmem:[%s2120_s21 + $0x28] sm:$0xff] %v792_v54  ;;  %v762_v13 = vadd.f32 %v730_v56, %v665_v50  ;;  %v732_v14 = vmul.f32 %v2042_v8, %v2132_v51  ;;  %v668_v19 = vmul.f32 %v2040_v7, %v2135_v52  ;;  %v794_v23 = vadd.f32 %v2067_v18, %v761_v59  ;;  %v2219_v56 = vld [vmem:[%s1994_s27 + $0x90] sm:$0xff]  ;;  %v2495_v46 = vld [vmem:[%s2004_s30 + $0x48] sm:$0xff] }
  0x9d   : > { %v763_v24 = vadd.f32 %v731_v61, %v666_v60  ;;  %v733_v25 = vmul.f32 %v2042_v8, %v2143_v57  ;;  %v669_v26 = vmul.f32 %v2040_v7, %v2146_v58  ;;  %825 = vst [vmem:[%s2120_s21 + $0x30] sm:$0xff] %v793_v12  ;;  %v734_v35 = vmul.f32 %v2042_v8, %v2156_v63  ;;  %v2228_v12 = vld [vmem:[%s2020_s18 + $0x90] sm:$0xff] }
  0x9e   : > { %v795_v30 = vadd.f32 %v2067_v18, %v762_v13  ;;  %v764_v31 = vadd.f32 %v732_v14, %v667_v62  ;;  %v670_v36 = vmul.f32 %v2040_v7, %v2159_v11  ;;  %3143 = vst [vmem:[#allocation32_spill] sm:$0xff] %v2195_v38  ;;  %826 = vst [vmem:[%s2120_s21 + $0x38] sm:$0xff] %v794_v23  ;;  %v2231_v13 = vld [vmem:[%s1994_s27 + $0x98] sm:$0xff] }
  0x9f   : > { %v796_v40 = vadd.f32 %v2067_v18, %v763_v24  ;;  %v765_v41 = vadd.f32 %v733_v25, %v668_v19  ;;  %v735_v42 = vmul.f32 %v2042_v8, %v2169_v20  ;;  %v671_v43 = vmul.f32 %v2040_v7, %v2172_v21  ;;  %3144 = vst [vmem:[#allocation33_spill] sm:$0xff] %v2207_v48  ;;  %v2240_v25 = vld [vmem:[%s2020_s18 + $0x98] sm:$0xff]  ;;  %v2372_v21 = vld [vmem:[%s1994_s27 + $0xf0] sm:$0xff] }
  0xa0   : > { %827 = vst [vmem:[%s2120_s21 + $0x40] sm:$0xff] %v795_v30  ;;  %v797_v49 = vadd.f32 %v2067_v18, %v764_v31  ;;  %v766_v50 = vadd.f32 %v734_v35, %v669_v26  ;;  %v736_v53 = vmul.f32 %v2042_v8, %v2180_v28  ;;  %v672_v54 = vmul.f32 %v2040_v7, %v2183_v29  ;;  %v2243_v26 = vld [vmem:[%s1994_s27 + $0xa0] sm:$0xff]  ;;  %v2358_v29 = vld [vmem:[%s1994_s27 + $0xe8] sm:$0xff] }
  0xa1   : > { %3145 = vst [vmem:[#allocation34_spill] sm:$0xff] %v2219_v56  ;;  %828 = vst [vmem:[%s2120_s21 + $0x48] sm:$0xff] %v796_v40  ;;  %v798_v59 = vadd.f32 %v2067_v18, %v765_v41  ;;  %v767_v60 = vadd.f32 %v735_v42, %v670_v36  ;;  %v737_v61 = vmul.f32 %v2042_v8, %v2192_v37  ;;  %v2252_v40 = vld [vmem:[%s2020_s18 + $0xa0] sm:$0xff]  ;;  %v2255_v41 = vld [vmem:[%s1994_s27 + $0xa8] sm:$0xff] }
  0xa2   : > { %v673_v62 = vmul.f32 %v2040_v7, %v2195_v38  ;;  %3146 = vst [vmem:[#allocation35_spill] sm:$0xff] %v2231_v13  ;;  %829 = vst [vmem:[%s2120_s21 + $0x50] sm:$0xff] %v797_v49  ;;  %v799_v14 = vadd.f32 %v2067_v18, %v766_v50  ;;  %v768_v19 = vadd.f32 %v736_v53, %v671_v43  ;;  %v2264_v53 = vld [vmem:[%s2020_s18 + $0xa8] sm:$0xff]  ;;  %v2344_v38 = vld [vmem:[%s1994_s27 + $0xe0] sm:$0xff] }
  0xa3   : > { %v738_v23 = vmul.f32 %v2042_v8, %v2204_v47  ;;  %v674_v24 = vmul.f32 %v2040_v7, %v2207_v48  ;;  %3147 = vst [vmem:[#allocation36_spill] sm:$0xff] %v2243_v26  ;;  %830 = vst [vmem:[%s2120_s21 + $0x58] sm:$0xff] %v798_v59  ;;  %v800_v30 = vadd.f32 %v2067_v18, %v767_v60 }
  0xa4   : > { %v769_v31 = vadd.f32 %v737_v61, %v672_v54  ;;  %v739_v35 = vmul.f32 %v2042_v8, %v2216_v55  ;;  %v675_v36 = vmul.f32 %v2040_v7, %v2219_v56  ;;  %3148 = vst [vmem:[#allocation37_spill] sm:$0xff] %v2255_v41  ;;  %831 = vst [vmem:[%s2120_s21 + $0x60] sm:$0xff] %v799_v14  ;;  %v2267_v54 = vld [vmem:[%s1994_s27 + $0xb0] sm:$0xff] }
  0xa5   : > { %v801_v42 = vadd.f32 %v2067_v18, %v768_v19  ;;  %v770_v43 = vadd.f32 %v738_v23, %v673_v62  ;;  %v740_v49 = vmul.f32 %v2042_v8, %v2228_v12  ;;  %v676_v50 = vmul.f32 %v2040_v7, %v2231_v13  ;;  %3149 = vst [vmem:[#allocation38_spill] sm:$0xff] %v2267_v54  ;;  %v2276_v14 = vld [vmem:[%s2020_s18 + $0xb0] sm:$0xff]  ;;  %v2279_v19 = vld [vmem:[%s1994_s27 + $0xb8] sm:$0xff] }
  0xa6   : > { %832 = vst [vmem:[%s2120_s21 + $0x68] sm:$0xff] %v800_v30  ;;  %v802_v59 = vadd.f32 %v2067_v18, %v769_v31  ;;  %v771_v60 = vadd.f32 %v739_v35, %v674_v24  ;;  %v741_v61 = vmul.f32 %v2042_v8, %v2240_v25  ;;  %v677_v62 = vmul.f32 %v2040_v7, %v2243_v26  ;;  %v2288_v35 = vld [vmem:[%s2020_s18 + $0xb8] sm:$0xff]  ;;  %v2291_v26 = vld [vmem:[%s1994_s27 + $0xc0] sm:$0xff]  ;;  %v2316_v56 = vld [vmem:[%s1994_s27 + $0xd0] sm:$0xff] }
  0xa7   : > { %3150 = vst [vmem:[#allocation39_spill] sm:$0xff] %v2279_v19  ;;  %833 = vst [vmem:[%s2120_s21 + $0x70] sm:$0xff] %v801_v42  ;;  %v803_v23 = vadd.f32 %v2067_v18, %v770_v43  ;;  %v772_v30 = vadd.f32 %v740_v49, %v675_v36  ;;  %v742_v24 = vmul.f32 %v2042_v8, %v2252_v40  ;;  %v2300_v49 = vld [vmem:[%s2020_s18 + $0xc0] sm:$0xff] }
  0xa8   : > { %v678_v31 = vmul.f32 %v2040_v7, %v2255_v41  ;;  %3151 = vst [vmem:[#allocation40_spill] sm:$0xff] %v2291_v26  ;;  %834 = vst [vmem:[%s2120_s21 + $0x78] sm:$0xff] %v802_v59  ;;  %v804_v42 = vadd.f32 %v2067_v18, %v771_v60  ;;  %v773_v13 = vadd.f32 %v741_v61, %v676_v50  ;;  %v2303_v41 = vld [vmem:[%s1994_s27 + $0xc8] sm:$0xff] }
  0xa9   : > { %v743_v36 = vmul.f32 %v2042_v8, %v2264_v53  ;;  %v679_v43 = vmul.f32 %v2040_v7, %v2267_v54  ;;  %3152 = vst [vmem:[#allocation41_spill] sm:$0xff] %v2303_v41  ;;  %835 = vst [vmem:[%s2120_s21 + $0x80] sm:$0xff] %v803_v23  ;;  %v805_v59 = vadd.f32 %v2067_v18, %v772_v30  ;;  %v2313_v54 = vld [vmem:[%s2020_s18 + $0xc8] sm:$0xff] }
  0xaa   : > { %v774_v60 = vadd.f32 %v742_v24, %v677_v62  ;;  %v744_v50 = vmul.f32 %v2042_v8, %v2276_v14  ;;  %v680_v61 = vmul.f32 %v2040_v7, %v2279_v19  ;;  %3153 = vst [vmem:[#allocation42_spill] sm:$0xff] %v2316_v56  ;;  %836 = vst [vmem:[%s2120_s21 + $0x88] sm:$0xff] %v804_v42  ;;  %v2326_v24 = vld [vmem:[%s2020_s18 + $0xd0] sm:$0xff]  ;;  %v2329_v19 = vld [vmem:[%s1994_s27 + $0xd8] sm:$0xff] }
  0xab   : > { %v806_v23 = vadd.f32 %v2067_v18, %v773_v13  ;;  %v775_v48 = vadd.f32 %v743_v36, %v678_v31  ;;  %v745_v62 = vmul.f32 %v2042_v8, %v2288_v35  ;;  %v681_v30 = vmul.f32 %v2040_v7, %v2291_v26  ;;  %3154 = vst [vmem:[#allocation43_spill] sm:$0xff] %v2329_v19  ;;  %v2341_v26 = vld [vmem:[%s2020_s18 + $0xd8] sm:$0xff] }
  0xac   : > { %837 = vst [vmem:[%s2120_s21 + $0x90] sm:$0xff] %v805_v59  ;;  %v807_v42 = vadd.f32 %v2067_v18, %v774_v60  ;;  %v776_v13 = vadd.f32 %v744_v50, %v679_v43  ;;  %v746_v31 = vmul.f32 %v2042_v8, %v2300_v49  ;;  %v682_v36 = vmul.f32 %v2040_v7, %v2303_v41  ;;  %v2355_v41 = vld [vmem:[%s2020_s18 + $0xe0] sm:$0xff] }
  0xad   : > { %3155 = vst [vmem:[#allocation44_spill] sm:$0xff] %v2344_v38  ;;  %838 = vst [vmem:[%s2120_s21 + $0x98] sm:$0xff] %v806_v23  ;;  %v808_v59 = vadd.f32 %v2067_v18, %v775_v48  ;;  %v777_v60 = vadd.f32 %v745_v62, %v680_v61  ;;  %v747_v43 = vmul.f32 %v2042_v8, %v2313_v54 }
  0xae   : > { %v683_v50 = vmul.f32 %v2040_v7, %v2316_v56  ;;  %3156 = vst [vmem:[#allocation45_spill] sm:$0xff] %v2358_v29  ;;  %839 = vst [vmem:[%s2120_s21 + $0xa0] sm:$0xff] %v807_v42  ;;  %v809_v23 = vadd.f32 %v2067_v18, %v776_v13  ;;  %v778_v48 = vadd.f32 %v746_v31, %v681_v30  ;;  %v2369_v56 = vld [vmem:[%s2020_s18 + $0xe8] sm:$0xff]  ;;  %v2381_v13 = vld [vmem:[%s2020_s18 + $0xf0] sm:$0xff] }
  0xaf   : > { %v748_v61 = vmul.f32 %v2042_v8, %v2326_v24  ;;  %v684_v62 = vmul.f32 %v2040_v7, %v2329_v19  ;;  %3157 = vst [vmem:[#allocation46_spill] sm:$0xff] %v2372_v21  ;;  %840 = vst [vmem:[%s2120_s21 + $0xa8] sm:$0xff] %v808_v59  ;;  %v810_v11 = vadd.f32 %v2067_v18, %v777_v60  ;;  %v2384_v31 = vld [vmem:[%s1994_s27 + $0xf8] sm:$0xff]  ;;  %s2434_s27 = sshll.u32 %s1707_s10, 12 }
  0xb0   : > { %v779_v58 = vadd.f32 %v747_v43, %v682_v36  ;;  %v749_v30 = vmul.f32 %v2042_v8, %v2341_v26  ;;  %v685_v42 = vmul.f32 %v2040_v7, %v2344_v38  ;;  %3158 = vst [vmem:[#allocation47_spill] sm:$0xff] %v2384_v31  ;;  %841 = vst [vmem:[%s2120_s21 + $0xb0] sm:$0xff] %v809_v23  ;;  %v2393_v43 = vld [vmem:[%s2020_s18 + $0xf8] sm:$0xff]  ;;  %s2471_s26 = scalar_lea.hbm %s3075_s5, %s2434_s27  ;;  %s1573_s18 = scalar_lea.vmem %s1572_s29, 8192 }
  0xb1   : > { %v811_v19 = vadd.f32 %v2067_v18, %v778_v48  ;;  %v780_v59 = vadd.f32 %v748_v61, %v683_v50  ;;  %v750_v36 = vmul.f32 %v2042_v8, %v2355_v41  ;;  %v686_v60 = vmul.f32 %v2040_v7, %v2358_v29  ;;  %842 = vst [vmem:[%s2120_s21 + $0xb8] sm:$0xff] %v810_v11  ;;  %v2402_v48 = vld [vmem:[%s2004_s30] sm:$0xff]  ;;  %p1575_p4 = scmp.lt.s32.totalorder %s1573_s18, %s1567_s24 }
  0xb2   : > { %v812_v38 = vadd.f32 %v2067_v18, %v779_v58  ;;  %v781_v52 = vadd.f32 %v749_v30, %v684_v62  ;;  %v751_v23 = vmul.f32 %v2042_v8, %v2369_v56  ;;  %v687_v50 = vmul.f32 %v2040_v7, %v2372_v21 }
  0xb3   : > { %843 = vst [vmem:[%s2120_s21 + $0xc0] sm:$0xff] %v811_v19  ;;  %v813_v61 = vadd.f32 %v2067_v18, %v780_v59  ;;  %v782_v11 = vadd.f32 %v750_v36, %v685_v42  ;;  %v752_v58 = vmul.f32 %v2042_v8, %v2381_v13  ;;  %v688_v62 = vmul.f32 %v2040_v7, %v2384_v31  ;;  %v2418_v42 = vld [vmem:[%s2004_s30 + $0x8] sm:$0xff]  ;;  %v2421_v36 = vld [vmem:[%s2004_s30 + $0x10] sm:$0xff]  ;;  %p1576_p9 = por %p1575_p4, %p1574_p1 }
  0xb4   : > { %844 = vst [vmem:[%s2120_s21 + $0xc8] sm:$0xff] %v812_v38  ;;  %v814_v30 = vadd.f32 %v2067_v18, %v781_v52  ;;  %v783_v21 = vadd.f32 %v751_v23, %v686_v60  ;;  %v753_v19 = vmul.f32 %v2042_v8, %v2393_v43  ;;  %v2415_v59 = vstv %s2332_s23  ;;  %v2431_v8 = vld [vmem:[%s2004_s30 + $0x18] sm:$0xff] }
  0xb5   : > { %845 = vst [vmem:[%s2120_s21 + $0xd0] sm:$0xff] %v813_v61  ;;  %v815_v7 = vadd.f32 %v2067_v18, %v782_v11  ;;  %v784_v31 = vadd.f32 %v752_v58, %v687_v50  ;;  %v430_v52 = vmul.f32 %v2415_v59, %v2402_v48  ;;  %v2428_v38 = vstv %s2346_s28  ;;  %v2445_v11 = vld [vmem:[%s2004_s30 + $0x20] sm:$0xff]  ;;  %p1577_p2 = pnand %p1576_p9, %p1570_p12 }
  0xb6   : > { %846 = vst [vmem:[%s2120_s21 + $0xd8] sm:$0xff] %v814_v30  ;;  %v816_v60 = vadd.f32 %v2067_v18, %v783_v21  ;;  %v785_v23 = vadd.f32 %v753_v19, %v688_v62  ;;  %v495_v50 = vmul.f32 %v2023_v1, %v2428_v38  ;;  %v2442_v61 = vstv %s2360_s25  ;;  %v2456_v1 = vld [vmem:[%s2004_s30 + $0x28] sm:$0xff] }
  0xb7   : > { %847 = vst [vmem:[%s2120_s21 + $0xe0] sm:$0xff] %v815_v7  ;;  %v817_v58 = vadd.f32 %v2067_v18, %v784_v31  ;;  %v431_v29 = vmul.f32 %v2415_v59, %v2418_v42  ;;  %v496_v21 = vmul.f32 %v2029_v3, %v2428_v38  ;;  %v432_v62 = vmul.f32 %v2415_v59, %v2421_v36  ;;  %v2465_v3 = vld [vmem:[%s2004_s30 + $0x30] sm:$0xff] }
  0xb8   : > { %848 = vst [vmem:[%s2120_s21 + $0xe8] sm:$0xff] %v816_v60  ;;  %v818_v30 = vadd.f32 %v2067_v18, %v785_v23  ;;  %v527_v19 = vadd.f32 %v495_v50, %v430_v52  ;;  %v497_v31 = vmul.f32 %v2035_v5, %v2428_v38  ;;  %v433_v7 = vmul.f32 %v2415_v59, %v2431_v8  ;;  %v2483_v23 = vld [vmem:[%s2004_s30 + $0x38] sm:$0xff] }
  0xb9   : > { %849 = vst [vmem:[%s2120_s21 + $0xf0] sm:$0xff] %v817_v58  ;;  %v528_v18 = vadd.f32 %v496_v21, %v431_v29  ;;  %v498_v5 = vmul.f32 %v2045_v9, %v2428_v38  ;;  %v434_v52 = vmul.f32 %v2415_v59, %v2445_v11  ;;  %v499_v60 = vmul.f32 %v2059_v15, %v2428_v38  ;;  %v2492_v21 = vld [vmem:[%s2004_s30 + $0x40] sm:$0xff] }
  0xba   : > { %850 = vst [vmem:[%s2120_s21 + $0xf8] sm:$0xff] %v818_v30  ;;  %v560_v50 = vadd.f32 %v2442_v61, %v527_v19  ;;  %v529_v58 = vadd.f32 %v497_v31, %v432_v62  ;;  %v435_v29 = vmul.f32 %v2415_v59, %v2456_v1  ;;  %v500_v9 = vmul.f32 %v2065_v17, %v2428_v38 }
  0xbb   : > { %v561_v15 = vadd.f32 %v2442_v61, %v528_v18  ;;  %v530_v44 = vadd.f32 %v498_v5, %v433_v7  ;;  %v531_v34 = vadd.f32 %v499_v60, %v434_v52  ;;  %v436_v30 = vmul.f32 %v2415_v59, %v2465_v3 }
  0xbc   : > { %1580 = shalt.err (!%p1577_p2)
}
  0xbd   : > { %s1581_s12 = scalar_lea.hbm %s2471_s26, 4096  ;;  %s1585_s2 = scalar_lea.hbm %s3075_s5, 8192 }
  0xbe   : > { %p1582_p0 = scmp.ne.s32.totalorder %s2471_s26, %s1581_s12  ;;  %p1586_p10 = scmp.lt.u32.totalorder %s2471_s26, %s3075_s5 }
  0xbf   : > { %p1587_p7 = scmp.lt.u32.totalorder %s1585_s2, %s1581_s12  ;;  %p1589_p3 = scmp.lt.u32.totalorder %s1581_s12, %s2471_s26 }
  0xc0   : > { %p1583_p5 = pnand %p1582_p0, %p3159_p13 }
  0xc1   : > { %p1588_p6 = por %p1587_p7, %p1586_p10 }
  0xc2   : > { %p1584_p8 = pneg %p1583_p5 }
  0xc3   : > { %p1590_p11 = por %p1589_p3, %p1588_p6 }
  0xc5   : > { %p1591_p12 = pnand %p1590_p11, %p1584_p8 }
  0xc7   : > { %1594 = shalt.err (!%p1591_p12)
}
  0xc8   : > { %s1724_s28 = smov 256   ;;  %s1725_s25 = smov 16   ;;  %v562_v17 = vadd.f32 %v2442_v61, %v529_v58  ;;  %v532_v62 = vadd.f32 %v500_v9, %v435_v29  ;;  %v501_v19 = vmul.f32 %v2083_v27, %v2428_v38  ;;  %v437_v31 = vmul.f32 %v2415_v59, %v2483_v23  ;;  %v2539_v7 = vld [vmem:[%s2004_s30 + $0x50] sm:$0xff]  ;;  %v2549_v27 = vld [vmem:[%s2004_s30 + $0x58] sm:$0xff]  ;;  %v2558_v29 = vld [vmem:[%s2004_s30 + $0x60] sm:$0xff] }
  0xc9   : > { %1387 = dma.vmem_to_hbm [thread:$0]  (%p3159_p13), %s2473_s22, 4096, %s2471_s26, %s2502_s14, %s1724_s28, %s1724_s28, %s1725_s25   ;;  %v563_v18 = vadd.f32 %v2442_v61, %v530_v44  ;;  %v564_v5 = vadd.f32 %v2442_v61, %v531_v34  ;;  %v502_v52 = vmul.f32 %v2095_v33, %v2428_v38  ;;  %v438_v60 = vmul.f32 %v2415_v59, %v2492_v21 }
  0xca   : > { %s2530_s10 = scalar_lea.vmem [#allocation10], %s1990_s15  ;;  %v533_v58 = vadd.f32 %v501_v19, %v436_v30  ;;  %v503_v44 = vmul.f32 %v2105_v39, %v2428_v38  ;;  %v439_v34 = vmul.f32 %v2415_v59, %v2495_v46  ;;  %v504_v9 = vmul.f32 %v2114_v45, %v2428_v38  ;;  %v2569_v39 = vld [vmem:[%s2004_s30 + $0x68] sm:$0xff]  ;;  %s391_s22 = sadd.s32 6, %s2011_s11 }
  0xcb   : > { %592 = vst [vmem:[%s2530_s10] sm:$0xff] %v560_v50  ;;  %593 = vst [vmem:[%s2530_s10 + $0x8] sm:$0xff] %v561_v15  ;;  %v565_v50 = vadd.f32 %v2442_v61, %v532_v62  ;;  %v534_v33 = vadd.f32 %v502_v52, %v437_v31  ;;  %v440_v15 = vmul.f32 %v2415_v59, %v2539_v7  ;;  %v2578_v31 = vld [vmem:[%s2004_s30 + $0x70] sm:$0xff]  ;;  %s393_s20 = sadd.s32 7, %s2011_s11  ;;  %s395_s26 = sadd.s32 8, %s2011_s11 }
  0xcc   : > { %594 = vst [vmem:[%s2530_s10 + $0x10] sm:$0xff] %v562_v17  ;;  %595 = vst [vmem:[%s2530_s10 + $0x18] sm:$0xff] %v563_v18  ;;  %v505_v30 = vmul.f32 %v2132_v51, %v2428_v38  ;;  %v566_v17 = vadd.f32 %v2442_v61, %v533_v58  ;;  %v535_v62 = vadd.f32 %v503_v44, %v438_v60  ;;  %s2697_s24 = sld [smem:[#allocation3 + %s391_s22]]  ;;  %s2799_s12 = scalar_lea.hbm %s3074_s4, %s2434_s27 }
  0xcd   : > { %596 = vst [vmem:[%s2530_s10 + $0x20] sm:$0xff] %v564_v5  ;;  %597 = vst [vmem:[%s2530_s10 + $0x28] sm:$0xff] %v565_v50  ;;  %v441_v19 = vmul.f32 %v2415_v59, %v2549_v27  ;;  %v506_v45 = vmul.f32 %v2143_v57, %v2428_v38  ;;  %v567_v18 = vadd.f32 %v2442_v61, %v534_v33  ;;  %v2584_v50 = vld [vmem:[%s2004_s30 + $0x78] sm:$0xff]  ;;  %s2708_s11 = sld [smem:[#allocation3 + %s393_s20]]  ;;  %s1079_s16 = scalar_lea.sflag [#allocation6], %s1987_s13 }
  0xce   : > { %v536_v51 = vadd.f32 %v504_v9, %v439_v34  ;;  %v537_v5 = vadd.f32 %v505_v30, %v440_v15  ;;  %v442_v52 = vmul.f32 %v2415_v59, %v2558_v29  ;;  %598 = vst [vmem:[%s2530_s10 + $0x30] sm:$0xff] %v566_v17  ;;  %v568_v60 = vadd.f32 %v2442_v61, %v535_v62  ;;  %v2593_v34 = vld [vmem:[%s2004_s30 + $0x80] sm:$0xff]  ;;  %s2720_s17 = sld [smem:[#allocation3 + %s395_s26]]  ;;  %s1726_s2 = smov [#allocation10]  }
  0xcf   : > { %v538_v58 = vadd.f32 %v506_v45, %v441_v19  ;;  %v507_v57 = vmul.f32 %v2156_v63, %v2428_v38  ;;  %v443_v44 = vmul.f32 %v2415_v59, %v2569_v39  ;;  %599 = vst [vmem:[%s2530_s10 + $0x38] sm:$0xff] %v567_v18  ;;  %v508_v15 = vmul.f32 %v2169_v20, %v2428_v38  ;;  %v2603_v63 = vld [vmem:[%s2004_s30 + $0x88] sm:$0xff]  ;;  %v2612_v18 = vld [vmem:[%s2004_s30 + $0x90] sm:$0xff]  ;;  %s1599_s0 = sshll.u32 %s1726_s2, 4  ;;  %s1600_s0 = int_to_ptr.vmem [resolvable:$false] %s1599_s0 }
  0xd0   : > { %v569_v33 = vadd.f32 %v2442_v61, %v536_v51  ;;  %v570_v9 = vadd.f32 %v2442_v61, %v537_v5  ;;  %v444_v30 = vmul.f32 %v2415_v59, %v2578_v31  ;;  %600 = vst [vmem:[%s2530_s10 + $0x40] sm:$0xff] %v568_v60  ;;  %v509_v19 = vmul.f32 %v2180_v28, %v2428_v38  ;;  %v2623_v28 = vld [vmem:[%s2004_s30 + $0x98] sm:$0xff]  ;;  %s1601_s23 = scalar_lea.vmem %s1600_s0, 8192 }
  0xd1   : > { %v571_v17 = vadd.f32 %v2442_v61, %v538_v58  ;;  %v539_v62 = vadd.f32 %v507_v57, %v442_v52  ;;  %v445_v45 = vmul.f32 %v2415_v59, %v2584_v50  ;;  %v540_v20 = vadd.f32 %v508_v15, %v443_v44  ;;  %v2632_v44 = vld [vmem:[%s2004_s30 + $0xa0] sm:$0xff] }
  0xd2   : > { %601 = vst [vmem:[%s2530_s10 + $0x48] sm:$0xff] %v569_v33  ;;  %602 = vst [vmem:[%s2530_s10 + $0x50] sm:$0xff] %v570_v9  ;;  %v510_v51 = vmul.f32 %v2192_v37, %v2428_v38  ;;  %v446_v5 = vmul.f32 %v2415_v59, %v2593_v34  ;;  %v511_v52 = vmul.f32 %v2204_v47, %v2428_v38 }
  0xd3   : > { %603 = vst [vmem:[%s2530_s10 + $0x58] sm:$0xff] %v571_v17  ;;  %v572_v60 = vadd.f32 %v2442_v61, %v539_v62  ;;  %v541_v58 = vadd.f32 %v509_v19, %v444_v30  ;;  %v447_v57 = vmul.f32 %v2415_v59, %v2603_v63  ;;  %v512_v37 = vmul.f32 %v2216_v55, %v2428_v38  ;;  %v2638_v17 = vld [vmem:[%s2004_s30 + $0xa8] sm:$0xff] }
  0xd4   : > { %v573_v33 = vadd.f32 %v2442_v61, %v540_v20  ;;  %v542_v47 = vadd.f32 %v510_v51, %v445_v45  ;;  %v543_v9 = vadd.f32 %v511_v52, %v446_v5  ;;  %v448_v15 = vmul.f32 %v2415_v59, %v2612_v18  ;;  %v2647_v45 = vld [vmem:[%s2004_s30 + $0xb0] sm:$0xff] }
  0xd5   : > { %604 = vst [vmem:[%s2530_s10 + $0x60] sm:$0xff] %v572_v60  ;;  %v574_v30 = vadd.f32 %v2442_v61, %v541_v58  ;;  %v544_v62 = vadd.f32 %v512_v37, %v447_v57  ;;  %v513_v55 = vmul.f32 %v2228_v12, %v2428_v38  ;;  %v449_v19 = vmul.f32 %v2415_v59, %v2623_v28  ;;  %v2657_v12 = vld [vmem:[%s2004_s30 + $0xb8] sm:$0xff] }
  0xd6   : > { %605 = vst [vmem:[%s2530_s10 + $0x68] sm:$0xff] %v573_v33  ;;  %v575_v20 = vadd.f32 %v2442_v61, %v542_v47  ;;  %v576_v51 = vadd.f32 %v2442_v61, %v543_v9  ;;  %v514_v5 = vmul.f32 %v2240_v25, %v2428_v38  ;;  %v450_v52 = vmul.f32 %v2415_v59, %v2632_v44  ;;  %v2666_v25 = vld [vmem:[%s2004_s30 + $0xc0] sm:$0xff] }
  0xd7   : > { %606 = vst [vmem:[%s2530_s10 + $0x70] sm:$0xff] %v574_v30  ;;  %v577_v60 = vadd.f32 %v2442_v61, %v544_v62  ;;  %v545_v58 = vadd.f32 %v513_v55, %v448_v15  ;;  %v515_v57 = vmul.f32 %v2252_v40, %v2428_v38  ;;  %v451_v37 = vmul.f32 %v2415_v59, %v2638_v17  ;;  %v2678_v15 = vld [vmem:[%s2004_s30 + $0xc8] sm:$0xff] }
  0xd8   : > { %607 = vst [vmem:[%s2530_s10 + $0x78] sm:$0xff] %v575_v20  ;;  %608 = vst [vmem:[%s2530_s10 + $0x80] sm:$0xff] %v576_v51  ;;  %v546_v33 = vadd.f32 %v514_v5, %v449_v19  ;;  %v516_v47 = vmul.f32 %v2264_v53, %v2428_v38  ;;  %v452_v9 = vmul.f32 %v2415_v59, %v2647_v45  ;;  %v2688_v19 = vld [vmem:[%s2004_s30 + $0xd0] sm:$0xff] }
  0xd9   : > { %v517_v40 = vmul.f32 %v2276_v14, %v2428_v38  ;;  %609 = vst [vmem:[%s2530_s10 + $0x88] sm:$0xff] %v577_v60  ;;  %v578_v30 = vadd.f32 %v2442_v61, %v545_v58  ;;  %v547_v62 = vadd.f32 %v515_v57, %v450_v52  ;;  %v453_v55 = vmul.f32 %v2415_v59, %v2657_v12  ;;  %v2695_v52 = vld [vmem:[%s2004_s30 + $0xd8] sm:$0xff] }
  0xda   : > { %v518_v53 = vmul.f32 %v2288_v35, %v2428_v38  ;;  %v579_v14 = vadd.f32 %v2442_v61, %v546_v33  ;;  %v548_v20 = vadd.f32 %v516_v47, %v451_v37  ;;  %v454_v5 = vmul.f32 %v2415_v59, %v2666_v25  ;;  %v2706_v37 = vld [vmem:[%s2004_s30 + $0xe0] sm:$0xff] }
  0xdb   : > { %v549_v51 = vadd.f32 %v517_v40, %v452_v9  ;;  %610 = vst [vmem:[%s2530_s10 + $0x90] sm:$0xff] %v578_v30  ;;  %v580_v35 = vadd.f32 %v2442_v61, %v547_v62  ;;  %v519_v58 = vmul.f32 %v2300_v49, %v2428_v38  ;;  %v455_v57 = vmul.f32 %v2415_v59, %v2678_v15  ;;  %v2718_v40 = vld [vmem:[%s2004_s30 + $0xe8] sm:$0xff] }
  0xdc   : > { %v550_v60 = vadd.f32 %v518_v53, %v453_v55  ;;  %611 = vst [vmem:[%s2530_s10 + $0x98] sm:$0xff] %v579_v14  ;;  %v581_v33 = vadd.f32 %v2442_v61, %v548_v20  ;;  %v520_v9 = vmul.f32 %v2313_v54, %v2428_v38  ;;  %v456_v49 = vmul.f32 %v2415_v59, %v2688_v19  ;;  %v2729_v54 = vld [vmem:[%s2004_s30 + $0xf0] sm:$0xff] }
  0xdd   : > { %v582_v47 = vadd.f32 %v2442_v61, %v549_v51  ;;  %612 = vst [vmem:[%s2530_s10 + $0xa0] sm:$0xff] %v580_v35  ;;  %v551_v62 = vadd.f32 %v519_v58, %v454_v5  ;;  %v521_v55 = vmul.f32 %v2326_v24, %v2428_v38  ;;  %v457_v53 = vmul.f32 %v2415_v59, %v2695_v52  ;;  %v2740_v24 = vld [vmem:[%s2004_s30 + $0xf8] sm:$0xff]  ;;  %s1104_s30 = sshll.u32 %s2530_s10, 4  ;;  %s2801_s30 = int_to_ptr.vmem [resolvable:$true] %s1104_s30 }
  0xde   : > { %v583_v30 = vadd.f32 %v2442_v61, %v550_v60  ;;  %613 = vst [vmem:[%s2530_s10 + $0xa8] sm:$0xff] %v581_v33  ;;  %v552_v14 = vadd.f32 %v520_v9, %v455_v57  ;;  %v522_v20 = vmul.f32 %v2341_v26, %v2428_v38  ;;  %v458_v51 = vmul.f32 %v2415_v59, %v2706_v37  ;;  %s1595_s21 = scalar_lea.vmem %s2801_s30, 4096  ;;  %p1602_p2 = scmp.lt.s32.totalorder %s2801_s30, %s1600_s0 }
  0xdf   : > { %614 = vst [vmem:[%s2530_s10 + $0xb0] sm:$0xff] %v582_v47  ;;  %v523_v5 = vmul.f32 %v2355_v41, %v2428_v38  ;;  %v584_v35 = vadd.f32 %v2442_v61, %v551_v62  ;;  %v553_v60 = vadd.f32 %v521_v55, %v456_v49  ;;  %v459_v58 = vmul.f32 %v2415_v59, %v2718_v40  ;;  %p1596_p1 = scmp.ne.s32.totalorder %s2801_s30, %s1595_s21  ;;  %p1603_p0 = scmp.lt.s32.totalorder %s1601_s23, %s1595_s21 }
  0xe0   : > { %615 = vst [vmem:[%s2530_s10 + $0xb8] sm:$0xff] %v583_v30  ;;  %v524_v26 = vmul.f32 %v2369_v56, %v2428_v38  ;;  %v585_v57 = vadd.f32 %v2442_v61, %v552_v14  ;;  %v554_v33 = vadd.f32 %v522_v20, %v457_v53  ;;  %v460_v41 = vmul.f32 %v2415_v59, %v2729_v54 }
  0xe1   : > { %v555_v47 = vadd.f32 %v523_v5, %v458_v51  ;;  %616 = vst [vmem:[%s2530_s10 + $0xc0] sm:$0xff] %v584_v35  ;;  %v586_v9 = vadd.f32 %v2442_v61, %v553_v60  ;;  %v525_v30 = vmul.f32 %v2381_v13, %v2428_v38  ;;  %v461_v56 = vmul.f32 %v2415_v59, %v2740_v24  ;;  %p1597_p4 = pnand %p1596_p1, %p3159_p13  ;;  %p1604_p5 = por %p1603_p0, %p1602_p2 }
  0xe2   : > { %v556_v49 = vadd.f32 %v524_v26, %v459_v58  ;;  %617 = vst [vmem:[%s2530_s10 + $0xc8] sm:$0xff] %v585_v57  ;;  %v587_v62 = vadd.f32 %v2442_v61, %v554_v33  ;;  %v526_v53 = vmul.f32 %v2393_v43, %v2428_v38  ;;  %v2763_v14 = vstv %s2697_s24 }
  0xe3   : > { %v588_v55 = vadd.f32 %v2442_v61, %v555_v47  ;;  %618 = vst [vmem:[%s2530_s10 + $0xd0] sm:$0xff] %v586_v9  ;;  %v557_v51 = vadd.f32 %v525_v30, %v460_v41  ;;  %v884_v13 = vmul.f32 %v2763_v14, %v2017_v0  ;;  %v2770_v59 = vstv %s2708_s11  ;;  %p1598_p9 = pneg %p1597_p4 }
  0xe4   : > { %v589_v20 = vadd.f32 %v2442_v61, %v556_v49  ;;  %619 = vst [vmem:[%s2530_s10 + $0xd8] sm:$0xff] %v587_v62  ;;  %v558_v5 = vadd.f32 %v526_v53, %v461_v56  ;;  %v949_v43 = vmul.f32 %v2770_v59, %v2402_v48  ;;  %v2778_v38 = vstv %s2720_s17 }
  0xe5   : > { %620 = vst [vmem:[%s2530_s10 + $0xe0] sm:$0xff] %v588_v55  ;;  %v885_v35 = vmul.f32 %v2763_v14, %v2026_v2  ;;  %v590_v0 = vadd.f32 %v2442_v61, %v557_v51  ;;  %v950_v60 = vmul.f32 %v2770_v59, %v2418_v42  ;;  %v886_v58 = vmul.f32 %v2763_v14, %v2032_v4  ;;  %p1605_p8 = pnand %p1604_p5, %p1598_p9 }
  0xe6   : > { %621 = vst [vmem:[%s2530_s10 + $0xe8] sm:$0xff] %v589_v20  ;;  %v951_v26 = vmul.f32 %v2770_v59, %v2421_v36  ;;  %v591_v48 = vadd.f32 %v2442_v61, %v558_v5  ;;  %v981_v57 = vadd.f32 %v949_v43, %v884_v13  ;;  %v887_v33 = vmul.f32 %v2763_v14, %v2038_v6 }
  0xe7   : > { %v952_v2 = vmul.f32 %v2770_v59, %v2431_v8  ;;  %622 = vst [vmem:[%s2530_s10 + $0xf0] sm:$0xff] %v590_v0  ;;  %v982_v4 = vadd.f32 %v950_v60, %v885_v35  ;;  %v888_v6 = vmul.f32 %v2763_v14, %v2048_v10  ;;  %v953_v36 = vmul.f32 %v2770_v59, %v2445_v11 }
  0xe8   : > { %v983_v42 = vadd.f32 %v951_v26, %v886_v58  ;;  %623 = vst [vmem:[%s2530_s10 + $0xf8] sm:$0xff] %v591_v48  ;;  %v1014_v8 = vadd.f32 %v2778_v38, %v981_v57  ;;  %v889_v47 = vmul.f32 %v2763_v14, %v2062_v16  ;;  %v954_v41 = vmul.f32 %v2770_v59, %v2456_v1 }
  0xe9   : > { %v984_v61 = vadd.f32 %v952_v2, %v887_v33  ;;  %v1015_v9 = vadd.f32 %v2778_v38, %v982_v4  ;;  %v985_v30 = vadd.f32 %v953_v36, %v888_v6  ;;  %v890_v10 = vmul.f32 %v2763_v14, %v2076_v22 }
  0xea   : > { %v1016_v49 = vadd.f32 %v2778_v38, %v983_v42 }
  0xeb   : > { %1608 = shalt.err (!%p1605_p8)
}
  0xec   : > { %s1609_s10 = scalar_lea.hbm %s2799_s12, 4096  ;;  %s1613_s26 = scalar_lea.hbm %s3074_s4, 8192 }
  0xed   : > { %p1610_p10 = scmp.ne.s32.totalorder %s2799_s12, %s1609_s10  ;;  %p1614_p3 = scmp.lt.u32.totalorder %s2799_s12, %s3074_s4 }
  0xee   : > { %p1615_p11 = scmp.lt.u32.totalorder %s1613_s26, %s1609_s10  ;;  %p1617_p1 = scmp.lt.u32.totalorder %s1609_s10, %s2799_s12 }
  0xef   : > { %p1611_p7 = pnand %p1610_p10, %p3159_p13 }
  0xf0   : > { %p1616_p12 = por %p1615_p11, %p1614_p3 }
  0xf1   : > { %p1612_p6 = pneg %p1611_p7 }
  0xf2   : > { %p1618_p4 = por %p1617_p1, %p1616_p12 }
  0xf4   : > { %p1619_p9 = pnand %p1618_p4, %p1612_p6 }
  0xf6   : > { %1622 = shalt.err (!%p1619_p9)
}
  0xf7   : > { %1386 = dma.vmem_to_hbm [thread:$0]  (%p3159_p13), %s2801_s30, 4096, %s2799_s12, %s1079_s16, %s1724_s28, %s1724_s28, %s1725_s25   ;;  %v1017_v16 = vadd.f32 %v2778_v38, %v984_v61  ;;  %v986_v22 = vadd.f32 %v954_v41, %v889_v47  ;;  %v955_v11 = vmul.f32 %v2770_v59, %v2465_v3  ;;  %v891_v1 = vmul.f32 %v2763_v14, %v2092_v32  ;;  %v3160_v55 = vld [vmem:[#allocation24_spill] sm:$0xff]  ;;  %v3161_v13 = vld [vmem:[#allocation25_spill] sm:$0xff]  ;;  %v3162_v35 = vld [vmem:[#allocation26_spill] sm:$0xff] }
  0xf8   : > { %s2846_s17 = scalar_lea.vmem [#allocation13], %s1990_s15  ;;  %v1018_v56 = vadd.f32 %v2778_v38, %v985_v30  ;;  %v956_v62 = vmul.f32 %v2770_v59, %v2483_v23  ;;  %v892_v53 = vmul.f32 %v2763_v14, %v3160_v55  ;;  %v957_v20 = vmul.f32 %v2770_v59, %v2492_v21  ;;  %v3163_v26 = vld [vmem:[#allocation27_spill] sm:$0xff]  ;;  %v3164_v4 = vld [vmem:[#allocation28_spill] sm:$0xff]  ;;  %v3166_v41 = vld [vmem:[#allocation30_spill] sm:$0xff]  ;;  %s3014_s29 = scalar_lea.hbm %s3076_s6, %s2434_s27 }
  0xf9   : > { %1046 = vst [vmem:[%s2846_s17] sm:$0xff] %v1014_v8  ;;  %1047 = vst [vmem:[%s2846_s17 + $0x8] sm:$0xff] %v1015_v9  ;;  %v1019_v3 = vadd.f32 %v2778_v38, %v986_v22  ;;  %v987_v51 = vadd.f32 %v955_v11, %v890_v10  ;;  %v893_v32 = vmul.f32 %v2763_v14, %v3161_v13  ;;  %v3165_v8 = vld [vmem:[#allocation29_spill] sm:$0xff]  ;;  %v3167_v10 = vld [vmem:[#allocation31_spill] sm:$0xff]  ;;  %s1140_s13 = sshll.u32 %s2846_s17, 4  ;;  %s1727_s12 = smov [#allocation13]   ;;  %s3016_s13 = int_to_ptr.vmem [resolvable:$true] %s1140_s13 }
  0xfa   : > { %1048 = vst [vmem:[%s2846_s17 + $0x10] sm:$0xff] %v1016_v49  ;;  %1049 = vst [vmem:[%s2846_s17 + $0x18] sm:$0xff] %v1017_v16  ;;  %v958_v5 = vmul.f32 %v2770_v59, %v2495_v46  ;;  %v988_v43 = vadd.f32 %v956_v62, %v891_v1  ;;  %v989_v23 = vadd.f32 %v957_v20, %v892_v53  ;;  %v3168_v1 = vld [vmem:[#allocation32_spill] sm:$0xff]  ;;  %v3169_v53 = vld [vmem:[#allocation33_spill] sm:$0xff]  ;;  %s1623_s18 = scalar_lea.vmem %s3016_s13, 4096  ;;  %s1627_s16 = sshll.u32 %s1727_s12, 4  ;;  %s1628_s16 = int_to_ptr.vmem [resolvable:$false] %s1627_s16 }
  0xfb   : > { %1050 = vst [vmem:[%s2846_s17 + $0x20] sm:$0xff] %v1018_v56  ;;  %v894_v0 = vmul.f32 %v2763_v14, %v3162_v35  ;;  %v959_v21 = vmul.f32 %v2770_v59, %v2539_v7  ;;  %1051 = vst [vmem:[%s2846_s17 + $0x28] sm:$0xff] %v1019_v3  ;;  %v1020_v60 = vadd.f32 %v2778_v38, %v987_v51  ;;  %v3171_v35 = vld [vmem:[#allocation35_spill] sm:$0xff]  ;;  %p1624_p2 = scmp.ne.s32.totalorder %s3016_s13, %s1623_s18  ;;  %s1629_s21 = scalar_lea.vmem %s1628_s16, 8192 }
  0xfc   : > { %v990_v58 = vadd.f32 %v958_v5, %v893_v32  ;;  %v895_v48 = vmul.f32 %v2763_v14, %v3163_v26  ;;  %v960_v46 = vmul.f32 %v2770_v59, %v2549_v27  ;;  %v1021_v57 = vadd.f32 %v2778_v38, %v988_v43  ;;  %v3170_v32 = vld [vmem:[#allocation34_spill] sm:$0xff]  ;;  %p1630_p8 = scmp.lt.s32.totalorder %s3016_s13, %s1628_s16  ;;  %p1631_p10 = scmp.lt.s32.totalorder %s1629_s21, %s1623_s18 }
  0xfd   : > { %v1022_v33 = vadd.f32 %v2778_v38, %v989_v23  ;;  %v991_v2 = vadd.f32 %v959_v21, %v894_v0  ;;  %v896_v7 = vmul.f32 %v2763_v14, %v3164_v4  ;;  %1052 = vst [vmem:[%s2846_s17 + $0x30] sm:$0xff] %v1020_v60  ;;  %v961_v36 = vmul.f32 %v2770_v59, %v2558_v29  ;;  %v3172_v60 = vld [vmem:[#allocation36_spill] sm:$0xff]  ;;  %v3174_v4 = vld [vmem:[#allocation38_spill] sm:$0xff]  ;;  %p1625_p0 = pnand %p1624_p2, %p3159_p13 }
  0xfe   : > { %v1023_v42 = vadd.f32 %v2778_v38, %v990_v58  ;;  %v992_v6 = vadd.f32 %v960_v46, %v895_v48  ;;  %v897_v27 = vmul.f32 %v2763_v14, %v3165_v8  ;;  %1053 = vst [vmem:[%s2846_s17 + $0x38] sm:$0xff] %v1021_v57  ;;  %v962_v47 = vmul.f32 %v2770_v59, %v2569_v39  ;;  %v3173_v46 = vld [vmem:[#allocation37_spill] sm:$0xff]  ;;  %p1632_p7 = por %p1631_p10, %p1630_p8 }
  0xff   : > { %1054 = vst [vmem:[%s2846_s17 + $0x40] sm:$0xff] %v1022_v33  ;;  %v1024_v61 = vadd.f32 %v2778_v38, %v991_v2  ;;  %v898_v9 = vmul.f32 %v2763_v14, %v3166_v41  ;;  %v963_v49 = vmul.f32 %v2770_v59, %v2578_v31  ;;  %v993_v30 = vadd.f32 %v961_v36, %v896_v7  ;;  %v3175_v36 = vld [vmem:[#allocation39_spill] sm:$0xff]  ;;  %v3176_v41 = vld [vmem:[#allocation40_spill] sm:$0xff]  ;;  %p1626_p5 = pneg %p1625_p0 }
 0x100   : > { %1055 = vst [vmem:[%s2846_s17 + $0x48] sm:$0xff] %v1023_v42  ;;  %v1025_v29 = vadd.f32 %v2778_v38, %v992_v6  ;;  %v899_v16 = vmul.f32 %v2763_v14, %v3167_v10  ;;  %v964_v22 = vmul.f32 %v2770_v59, %v2584_v50  ;;  %v994_v11 = vadd.f32 %v962_v47, %v897_v27 }
 0x101   : > { %1056 = vst [vmem:[%s2846_s17 + $0x50] sm:$0xff] %v1024_v61  ;;  %v995_v39 = vadd.f32 %v963_v49, %v898_v9  ;;  %v900_v56 = vmul.f32 %v2763_v14, %v3168_v1  ;;  %v965_v31 = vmul.f32 %v2770_v59, %v2593_v34  ;;  %v1026_v62 = vadd.f32 %v2778_v38, %v993_v30  ;;  %v3177_v30 = vld [vmem:[#allocation41_spill] sm:$0xff]  ;;  %p1633_p6 = pnand %p1632_p7, %p1626_p5 }
 0x102   : > { %1057 = vst [vmem:[%s2846_s17 + $0x58] sm:$0xff] %v1025_v29  ;;  %v996_v55 = vadd.f32 %v964_v22, %v899_v16  ;;  %v901_v20 = vmul.f32 %v2763_v14, %v3169_v53  ;;  %v966_v50 = vmul.f32 %v2770_v59, %v2603_v63  ;;  %v1027_v3 = vadd.f32 %v2778_v38, %v994_v11  ;;  %v3178_v22 = vld [vmem:[#allocation42_spill] sm:$0xff]  ;;  %v3180_v53 = vld [vmem:[#allocation44_spill] sm:$0xff] }
 0x103   : > { %v1028_v51 = vadd.f32 %v2778_v38, %v995_v39  ;;  %v997_v13 = vadd.f32 %v965_v31, %v900_v56  ;;  %v902_v34 = vmul.f32 %v2763_v14, %v3170_v32  ;;  %1058 = vst [vmem:[%s2846_s17 + $0x60] sm:$0xff] %v1026_v62  ;;  %v967_v23 = vmul.f32 %v2770_v59, %v2612_v18  ;;  %v3179_v56 = vld [vmem:[#allocation43_spill] sm:$0xff] }
 0x104   : > { %v1029_v5 = vadd.f32 %v2778_v38, %v996_v55  ;;  %v998_v43 = vadd.f32 %v966_v50, %v901_v20  ;;  %v903_v63 = vmul.f32 %v2763_v14, %v3171_v35  ;;  %1059 = vst [vmem:[%s2846_s17 + $0x68] sm:$0xff] %v1027_v3  ;;  %v968_v21 = vmul.f32 %v2770_v59, %v2623_v28 }
 0x105   : > { %1060 = vst [vmem:[%s2846_s17 + $0x70] sm:$0xff] %v1028_v51  ;;  %v1030_v0 = vadd.f32 %v2778_v38, %v997_v13  ;;  %v904_v58 = vmul.f32 %v2763_v14, %v3172_v60  ;;  %v969_v26 = vmul.f32 %v2770_v59, %v2632_v44  ;;  %v999_v48 = vadd.f32 %v967_v23, %v902_v34  ;;  %v3181_v51 = vld [vmem:[#allocation45_spill] sm:$0xff] }
 0x106   : > { %1061 = vst [vmem:[%s2846_s17 + $0x78] sm:$0xff] %v1029_v5  ;;  %v1031_v18 = vadd.f32 %v2778_v38, %v998_v43  ;;  %v905_v57 = vmul.f32 %v2763_v14, %v3173_v46  ;;  %v970_v33 = vmul.f32 %v2770_v59, %v2638_v17  ;;  %v1000_v2 = vadd.f32 %v968_v21, %v903_v63 }
 0x107   : > { %1062 = vst [vmem:[%s2846_s17 + $0x80] sm:$0xff] %v1030_v0  ;;  %v1001_v28 = vadd.f32 %v969_v26, %v904_v58  ;;  %v906_v7 = vmul.f32 %v2763_v14, %v3174_v4  ;;  %v971_v44 = vmul.f32 %v2770_v59, %v2647_v45  ;;  %v1032_v42 = vadd.f32 %v2778_v38, %v999_v48 }
 0x108   : > { %1063 = vst [vmem:[%s2846_s17 + $0x88] sm:$0xff] %v1031_v18  ;;  %v1002_v6 = vadd.f32 %v970_v33, %v905_v57  ;;  %v907_v8 = vmul.f32 %v2763_v14, %v3175_v36  ;;  %v972_v17 = vmul.f32 %v2770_v59, %v2657_v12  ;;  %v1033_v27 = vadd.f32 %v2778_v38, %v1000_v2 }
 0x109   : > { %v1034_v61 = vadd.f32 %v2778_v38, %v1001_v28  ;;  %v1003_v47 = vadd.f32 %v971_v44, %v906_v7  ;;  %v908_v45 = vmul.f32 %v2763_v14, %v3176_v41  ;;  %1064 = vst [vmem:[%s2846_s17 + $0x90] sm:$0xff] %v1032_v42  ;;  %v973_v29 = vmul.f32 %v2770_v59, %v2666_v25 }
 0x10a   : > { %v1035_v9 = vadd.f32 %v2778_v38, %v1002_v6  ;;  %v1004_v49 = vadd.f32 %v972_v17, %v907_v8  ;;  %v909_v12 = vmul.f32 %v2763_v14, %v3177_v30  ;;  %1065 = vst [vmem:[%s2846_s17 + $0x98] sm:$0xff] %v1033_v27  ;;  %v974_v16 = vmul.f32 %v2770_v59, %v2678_v15 }
 0x10b   : > { %1066 = vst [vmem:[%s2846_s17 + $0xa0] sm:$0xff] %v1034_v61  ;;  %v1036_v10 = vadd.f32 %v2778_v38, %v1003_v47  ;;  %v910_v11 = vmul.f32 %v2763_v14, %v3178_v22  ;;  %v975_v39 = vmul.f32 %v2770_v59, %v2688_v19  ;;  %v1005_v1 = vadd.f32 %v973_v29, %v908_v45 }
 0x10c   : > { %1067 = vst [vmem:[%s2846_s17 + $0xa8] sm:$0xff] %v1035_v9  ;;  %v1037_v25 = vadd.f32 %v2778_v38, %v1004_v49  ;;  %v911_v31 = vmul.f32 %v2763_v14, %v3179_v56  ;;  %v976_v62 = vmul.f32 %v2770_v59, %v2695_v52  ;;  %v1006_v55 = vadd.f32 %v974_v16, %v909_v12 }
 0x10d   : > { %1068 = vst [vmem:[%s2846_s17 + $0xb0] sm:$0xff] %v1036_v10  ;;  %v1007_v15 = vadd.f32 %v975_v39, %v910_v11  ;;  %v912_v20 = vmul.f32 %v2763_v14, %v3180_v53  ;;  %v977_v19 = vmul.f32 %v2770_v59, %v2706_v37  ;;  %v1038_v50 = vadd.f32 %v2778_v38, %v1005_v1  ;;  %v3182_v37 = vld [vmem:[#allocation46_spill] sm:$0xff] }
 0x10e   : > { %1069 = vst [vmem:[%s2846_s17 + $0xb8] sm:$0xff] %v1037_v25  ;;  %v1008_v3 = vadd.f32 %v976_v62, %v911_v31  ;;  %v913_v13 = vmul.f32 %v2763_v14, %v3181_v51  ;;  %v978_v52 = vmul.f32 %v2770_v59, %v2718_v40  ;;  %v1039_v32 = vadd.f32 %v2778_v38, %v1006_v55  ;;  %v3183_v40 = vld [vmem:[#allocation47_spill] sm:$0xff] }
 0x10f   : > { %v1040_v34 = vadd.f32 %v2778_v38, %v1007_v15  ;;  %v1009_v5 = vadd.f32 %v977_v19, %v912_v20  ;;  %v914_v43 = vmul.f32 %v2763_v14, %v3182_v37  ;;  %1070 = vst [vmem:[%s2846_s17 + $0xc0] sm:$0xff] %v1038_v50  ;;  %v979_v63 = vmul.f32 %v2770_v59, %v2729_v54 }
 0x110   : > { %v1041_v23 = vadd.f32 %v2778_v38, %v1008_v3  ;;  %v1010_v35 = vadd.f32 %v978_v52, %v913_v13  ;;  %v915_v0 = vmul.f32 %v2763_v14, %v3183_v40  ;;  %1071 = vst [vmem:[%s2846_s17 + $0xc8] sm:$0xff] %v1039_v32  ;;  %v980_v60 = vmul.f32 %v2770_v59, %v2740_v24 }
 0x111   : > { %1072 = vst [vmem:[%s2846_s17 + $0xd0] sm:$0xff] %v1040_v34  ;;  %v1042_v21 = vadd.f32 %v2778_v38, %v1009_v5  ;;  %v1011_v26 = vadd.f32 %v979_v63, %v914_v43 }
 0x112   : > { %1073 = vst [vmem:[%s2846_s17 + $0xd8] sm:$0xff] %v1041_v23  ;;  %v1043_v58 = vadd.f32 %v2778_v38, %v1010_v35  ;;  %v1012_v54 = vadd.f32 %v980_v60, %v915_v0 }
 0x113   : > { %1074 = vst [vmem:[%s2846_s17 + $0xe0] sm:$0xff] %v1042_v21  ;;  %v1044_v14 = vadd.f32 %v2778_v38, %v1011_v26 }
 0x114   : > { %1075 = vst [vmem:[%s2846_s17 + $0xe8] sm:$0xff] %v1043_v58  ;;  %v1045_v18 = vadd.f32 %v2778_v38, %v1012_v54 }
 0x115   : > { %1076 = vst [vmem:[%s2846_s17 + $0xf0] sm:$0xff] %v1044_v14 }
 0x116   : > { %1077 = vst [vmem:[%s2846_s17 + $0xf8] sm:$0xff] %v1045_v18 }
 0x117   : > { %1636 = shalt.err (!%p1633_p6)
}
 0x118   : > { %s1637_s27 = scalar_lea.hbm %s3014_s29, 4096  ;;  %s1641_s23 = scalar_lea.hbm %s3076_s6, 8192 }
 0x119   : > { %p1638_p3 = scmp.ne.s32.totalorder %s3014_s29, %s1637_s27  ;;  %p1642_p1 = scmp.lt.u32.totalorder %s3014_s29, %s3076_s6 }
 0x11a   : > { %p1643_p4 = scmp.lt.u32.totalorder %s1641_s23, %s1637_s27  ;;  %p1645_p2 = scmp.lt.u32.totalorder %s1637_s27, %s3014_s29 }
 0x11b   : > { %p1639_p11 = pnand %p1638_p3, %p3159_p13 }
 0x11c   : > { %p1644_p9 = por %p1643_p4, %p1642_p1 }
 0x11d   : > { %p1640_p12 = pneg %p1639_p11 }
 0x11e   : > { %p1646_p0 = por %p1645_p2, %p1644_p9 }
 0x120   : > { %p1647_p5 = pnand %p1646_p0, %p1640_p12 }
 0x122   : > { %1650 = shalt.err (!%p1647_p5)
}
 0x123   : > { %1388 = dma.vmem_to_hbm [thread:$0]  (%p3159_p13), %s3016_s13, 4096, %s3014_s29, %s2502_s14, %s1724_s28, %s1724_s28, %s1725_s25  }
 0x124 PF: > { %s3184_s20 = sld [smem:[#allocation23_spill]]  ;;  %s3185_s26 = sld [smem:[#allocation20_spill]] }
 0x125   : > { %s1155_s24 = sand.u32 1, %s1695_s7  }
 0x126   : > { %s1156_s11 = scalar_lea.sflag [#allocation6], %s1155_s24 }
 0x12a   : > { %p3186_p8 = scmp.ne.s32.totalorder %s3184_s20, 0  ;;  %p3187_p10 = scmp.ge.s32.totalorder %s3185_s26, 2 }
 0x12c   : > { %p1403_p7 = pnand %p3187_p10, %p3186_p8 }
 0x12e   : > { %1686 = dma.done.wait (!%p1403_p7), %s1156_s11, 4096  }
 0x12f   : > { %1688 = vsyncadd (!%p1403_p7), %s1156_s11, 4294963200  ;;  %s3188_s19 = sadd.s32 4294967294, %s3185_s26  }
 0x130   : > { %s1164_s17 = sand.u32 1, %s3188_s19  }
 0x131   : > { %s1165_s15 = scalar_lea.sflag [#allocation12], %s1164_s17 }
 0x132   : > { %1690 = dma.done.wait (!%p1403_p7), %s1165_s15, 8192  }
 0x133   : > { %1692 = vsyncadd (!%p1403_p7), %s1165_s15, 4294959104  ;;  %s33_s11 = sadd.s32 1, %s3185_s26   ;;  %s3189_s14 = sld [smem:[#allocation22_spill]] }
 0x134   : > { %p30_p13 = scmp.ge.s32.totalorder %s33_s11, 4   ;;  %s3190_s10 = sld [smem:[#allocation19_spill]] }
 0x135   : > { %s3191_s0 = sld [smem:[#allocation21_spill]]  ;;  %s3192_s7 = smov %s1699_s8 }
 0x136   : > { %s3193_s8 = smov %s1703_s9  ;;  %32 = sbr.rel (!%p30_p13) target bundleno = 22 (0x16), region = 133 }
 0x139   : > { %s3194_s9 = smov %s3189_s14 }
 0x13d   :  { %1179 = vsyncpa [#allocation5], 1 }
 0x13e   :  { %1181 = vsyncpa [#allocation5 + $0x1], 1 }
 0x13f   :  { %1182 = vsyncpa [#allocation8], 1 }
 0x140   :  { %1184 = vsyncpa [#allocation8 + $0x1], 1 }
 0x141   :  { %1185 = vsyncpa [#allocation6], 1 }
 0x142   :  { %1187 = vsyncpa [#allocation6 + $0x1], 1 }
 0x143   :  { %1188 = vsyncpa [#allocation12], 1 }
 0x144   :  { %1190 = vsyncpa [#allocation12 + $0x1], 1 }

</bundles_post_ra>
